<compile_context>
chip_gen: v7x
topology: tpu7x:2x2x1
jax: 0.10.0
libtpu: 0.0.40
codegen_flags: <defaults>
</compile_context>

<pallas_src>
import functools
import math

import jax
import jax.numpy as jnp
from jax import lax
from jax.experimental import pallas as pl
from jax.experimental.pallas import tpu as pltpu


def _kr_fused_kernel(qt_ref, dt_ref,
                     w_in1_ref, b_in1_ref, wo1_ref, bo1_ref, g1_ref, be1_ref,
                     w_qk2_ref, b_qk2_ref, w_v2_ref, b_v2_ref,
                     wo2_ref, bo2_ref, g2_ref, be2_ref,
                     qt_out_ref, ht_out_ref,
                     *, seq, dim, num_heads, head_dim, ln_eps):
    """One grid step == one batch element: two fused (MHA + residual + LN) blocks."""
    qt = qt_ref[0].astype(jnp.float32)   # (S, D)
    dt = dt_ref[0].astype(jnp.float32)   # (S, D)

    def heads_major(x2d, groups):
        # (S, groups*D) -> (groups*H, S, dh): one reshape + one transpose,
        # no repeated lane-axis column slicing.
        return x2d.reshape(seq, groups * num_heads, head_dim).transpose(1, 0, 2)

    def attention(qk_heads, v_heads, wo_ref, bo_ref):
        # qk_heads: (2H, S, dh) — queries in [0:H] (already 1/sqrt(dh)-scaled),
        # keys in [H:2H].  v_heads: (H, S, dh).
        qh = qk_heads[:num_heads]
        kh = qk_heads[num_heads:2 * num_heads]
        s = jnp.einsum("hqd,hkd->hqk", qh, kh,
                       preferred_element_type=jnp.float32)        # (H, S, S)
        s = s - jnp.max(s, axis=-1, keepdims=True)
        p = jnp.exp(s)
        # exact reciprocal keeps the kernel within 1e-4 of the f32 reference.
        p = p * pl.reciprocal(jnp.sum(p, axis=-1, keepdims=True), approx=False)
        o = jnp.einsum("hqk,hkd->hqd", p, v_heads,
                       preferred_element_type=jnp.float32)        # (H, S, dh)
        o = o.transpose(1, 0, 2).reshape(seq, dim)                # (S, D)
        return jnp.dot(o, wo_ref[...],
                       preferred_element_type=jnp.float32) + bo_ref[...]

    def layer_norm(x, g_ref, be_ref):
        mean = jnp.mean(x, axis=-1, keepdims=True)
        xc = x - mean
        var = jnp.mean(xc * xc, axis=-1, keepdims=True)
        return xc * lax.rsqrt(var + ln_eps) * g_ref[...] + be_ref[...]

    # ---- block 1: attn_question(qt, qt, qt) --------------------------------
    # one wide (S, D) @ (D, 3D) MXU matmul produces Q, K, V together.
    qkv1 = jnp.dot(qt, w_in1_ref[...],
                   preferred_element_type=jnp.float32) + b_in1_ref[...]
    qkv1_h = heads_major(qkv1, 3)                                  # (3H, S, dh)
    o1 = attention(qkv1_h[:2 * num_heads], qkv1_h[2 * num_heads:],
                   wo1_ref, bo1_ref)
    qt_hat = layer_norm(qt + o1, g1_ref, be1_ref)                  # stays on-chip

    # ---- block 2: attn_state(qt_hat, qt_hat, d_t) ---------------------------
    qk2 = jnp.dot(qt_hat, w_qk2_ref[...],
                  preferred_element_type=jnp.float32) + b_qk2_ref[...]
    v2 = jnp.dot(dt, w_v2_ref[...],
                 preferred_element_type=jnp.float32) + b_v2_ref[...]
    o2 = attention(heads_major(qk2, 2), heads_major(v2, 1), wo2_ref, bo2_ref)
    h_t = layer_norm(qt_hat + o2, g2_ref, be2_ref)

    # full-slab, lane-dense stores; the [:, :-1, :] slice happens in the wrapper.
    qt_out_ref[0] = qt_hat.astype(qt_out_ref.dtype)
    ht_out_ref[0] = h_t.astype(ht_out_ref.dtype)


def knowledge_retriever(qt, d_t, params_q, params_s, *, num_heads):
    """KnowledgeRetriever.forward (eval mode, dropout == identity)."""
    # TODO(synk): the unbatched 2-D input branch of the original module (which
    # returns unsliced outputs) is not implemented; batched 3-D inputs only.
    assert qt.ndim == 3 and d_t.shape == qt.shape
    B, S, D = qt.shape
    dh = D // num_heads
    scale = 1.0 / math.sqrt(dh)

    # Fuse [wq|wk|wv] -> (D, 3D) and fold the query scale into wq / bq.
    p1, p2 = params_q, params_s
    w_in1 = jnp.concatenate([p1["wq"] * scale, p1["wk"], p1["wv"]], axis=1)
    b_in1 = jnp.concatenate([p1["bq"] * scale, p1["bk"], p1["bv"]], axis=1)
    w_qk2 = jnp.concatenate([p2["wq"] * scale, p2["wk"]], axis=1)
    b_qk2 = jnp.concatenate([p2["bq"] * scale, p2["bk"]], axis=1)

    kernel = functools.partial(_kr_fused_kernel, seq=S, dim=D,
                               num_heads=num_heads, head_dim=dh, ln_eps=1e-5)

    def act_spec():
        # one batch element per grid step
        return pl.BlockSpec((1, S, D), lambda b: (b, 0, 0))

    def resident_spec(shape):
        # constant block index -> weight stays resident in VMEM across steps
        nd = len(shape)
        return pl.BlockSpec(shape, lambda b, _nd=nd: (0,) * _nd)

    weight_arrays = (w_in1, b_in1, p1["wo"], p1["bo"], p1["gamma"], p1["beta"],
                     w_qk2, b_qk2, p2["wv"], p2["bv"],
                     p2["wo"], p2["bo"], p2["gamma"], p2["beta"])

    in_specs = [act_spec(), act_spec()] + [resident_spec(w.shape)
                                           for w in weight_arrays]

    out_shape = (jax.ShapeDtypeStruct((B, S, D), qt.dtype),
                 jax.ShapeDtypeStruct((B, S, D), qt.dtype))

    qt_hat, h_t = pl.pallas_call(
        kernel,
        out_shape=out_shape,
        grid_spec=pltpu.PrefetchScalarGridSpec(
            num_scalar_prefetch=0,
            grid=(B,),
            in_specs=in_specs,
            out_specs=[act_spec(), act_spec()]),
        compiler_params=pltpu.CompilerParams(
            dimension_semantics=("parallel",)),
    )(qt, d_t, *weight_arrays)

    # module's 3-D branch drops the last time step; sliced here so the kernel's
    # output stores stay full-slab / aligned.
    return qt_hat[:, :-1, :], h_t[:, :-1, :]


def init_mha_params(key, dim):
    """Deterministic synthetic init of one MultiHeadAttention block's params.

    PyTorch keeps in_proj_weight of shape (3*dim, dim) and applies x @ W^T;
    here we store the already-transposed (dim, dim) matrices so the kernel
    computes x @ W + b.
    """
    ks = jax.random.split(key, 5)
    scale = 0.1
    return {
        "wq": scale * jax.random.normal(ks[0], (dim, dim), jnp.float32),
        "wk": scale * jax.random.normal(ks[1], (dim, dim), jnp.float32),
        "wv": scale * jax.random.normal(ks[2], (dim, dim), jnp.float32),
        "bq": scale * jax.random.normal(ks[3], (1, dim), jnp.float32),
        "bk": jnp.zeros((1, dim), jnp.float32),
        "bv": jnp.zeros((1, dim), jnp.float32),
        "wo": scale * jax.random.normal(ks[4], (dim, dim), jnp.float32),
        "bo": jnp.zeros((1, dim), jnp.float32),
        "gamma": jnp.ones((1, dim), jnp.float32),
        "beta": jnp.zeros((1, dim), jnp.float32),
    }


# ---------------- pure-JAX reference for verification ----------------
def _ref_mha_block(q, k, v, p, num_heads):
    B, S, D = q.shape
    dh = D // num_heads
    Q = q @ p["wq"] + p["bq"][0]
    K = k @ p["wk"] + p["bk"][0]
    V = v @ p["wv"] + p["bv"][0]
    Qh = Q.reshape(B, S, num_heads, dh).transpose(0, 2, 1, 3)
    Kh = K.reshape(B, S, num_heads, dh).transpose(0, 2, 1, 3)
    Vh = V.reshape(B, S, num_heads, dh).transpose(0, 2, 1, 3)
    s = jnp.einsum("bhqd,bhkd->bhqk", Qh, Kh) / math.sqrt(dh)
    a = jax.nn.softmax(s, axis=-1)
    o = jnp.einsum("bhqk,bhkd->bhqd", a, Vh).transpose(0, 2, 1, 3).reshape(B, S, D)
    o = o @ p["wo"] + p["bo"][0]
    x = q + o
    mean = x.mean(-1, keepdims=True)
    var = ((x - mean) ** 2).mean(-1, keepdims=True)
    return (x - mean) / jnp.sqrt(var + 1e-5) * p["gamma"][0] + p["beta"][0]


if __name__ == "__main__":
    B, S, D, H = 2, 8, 32, 4   # batch, seq, dim_q, num_heads

    root = jax.random.PRNGKey(0)
    k_qt, k_dt, k_p1, k_p2 = jax.random.split(root, 4)

    qt = jax.random.normal(k_qt, (B, S, D), jnp.float32)
    d_t = jax.random.normal(k_dt, (B, S, D), jnp.float32)

    params_q = init_mha_params(k_p1, D)   # attn_question
    params_s = init_mha_params(k_p2, D)   # attn_state

    qt_hat, h_t = knowledge_retriever(qt, d_t, params_q, params_s, num_heads=H)
    qt_hat = jax.block_until_ready(qt_hat)
    h_t = jax.block_until_ready(h_t)

    # verify against pure-JAX reference
    ref_qt_hat = _ref_mha_block(qt, qt, qt, params_q, H)
    ref_h_t = _ref_mha_block(ref_qt_hat, ref_qt_hat, d_t, params_s, H)
    assert qt_hat.shape == (B, S - 1, D) and h_t.shape == (B, S - 1, D)
    assert jnp.allclose(qt_hat, ref_qt_hat[:, :-1, :], atol=1e-4, rtol=1e-4)
    assert jnp.allclose(h_t, ref_h_t[:, :-1, :], atol=1e-4, rtol=1e-4)

    print("KERNEL_OK")
</pallas_src>

<mosaic_0001>
module attributes {stable_mosaic.version = 11 : i64} {
  func.func @_kr_fused_kernel(%arg0: i32, %arg1: memref<1x8x32xf32, #tpu.memory_space<vmem>>, %arg2: memref<1x8x32xf32, #tpu.memory_space<vmem>>, %arg3: memref<32x96xf32, #tpu.memory_space<vmem>>, %arg4: memref<1x96xf32, #tpu.memory_space<vmem>>, %arg5: memref<32x32xf32, #tpu.memory_space<vmem>>, %arg6: memref<1x32xf32, #tpu.memory_space<vmem>>, %arg7: memref<1x32xf32, #tpu.memory_space<vmem>>, %arg8: memref<1x32xf32, #tpu.memory_space<vmem>>, %arg9: memref<32x64xf32, #tpu.memory_space<vmem>>, %arg10: memref<1x64xf32, #tpu.memory_space<vmem>>, %arg11: memref<32x32xf32, #tpu.memory_space<vmem>>, %arg12: memref<1x32xf32, #tpu.memory_space<vmem>>, %arg13: memref<32x32xf32, #tpu.memory_space<vmem>>, %arg14: memref<1x32xf32, #tpu.memory_space<vmem>>, %arg15: memref<1x32xf32, #tpu.memory_space<vmem>>, %arg16: memref<1x32xf32, #tpu.memory_space<vmem>>, %arg17: memref<1x8x32xf32, #tpu.memory_space<vmem>>, %arg18: memref<1x8x32xf32, #tpu.memory_space<vmem>>) attributes {dimension_semantics = [#tpu.dimension_semantics<parallel>], iteration_bounds = array<i64: 2>, scalar_prefetch = 0 : i64, scratch_operands = 0 : i64, tpu.core_type = #tpu.core_type<tc>, window_params = [{transform_indices = @transform_0, window_bounds = array<i64: 1, 8, 32>}, {transform_indices = @transform_1, window_bounds = array<i64: 1, 8, 32>}, {pipeline_mode = #tpu.pipeline_mode<synchronous>, transform_indices = @transform_2, window_bounds = array<i64: 32, 96>}, {pipeline_mode = #tpu.pipeline_mode<synchronous>, transform_indices = @transform_3, window_bounds = array<i64: 1, 96>}, {pipeline_mode = #tpu.pipeline_mode<synchronous>, transform_indices = @transform_4, window_bounds = array<i64: 32, 32>}, {pipeline_mode = #tpu.pipeline_mode<synchronous>, transform_indices = @transform_5, window_bounds = array<i64: 1, 32>}, {pipeline_mode = #tpu.pipeline_mode<synchronous>, transform_indices = @transform_6, window_bounds = array<i64: 1, 32>}, {pipeline_mode = #tpu.pipeline_mode<synchronous>, transform_indices = @transform_7, window_bounds = array<i64: 1, 32>}, {pipeline_mode = #tpu.pipeline_mode<synchronous>, transform_indices = @transform_8, window_bounds = array<i64: 32, 64>}, {pipeline_mode = #tpu.pipeline_mode<synchronous>, transform_indices = @transform_9, window_bounds = array<i64: 1, 64>}, {pipeline_mode = #tpu.pipeline_mode<synchronous>, transform_indices = @transform_10, window_bounds = array<i64: 32, 32>}, {pipeline_mode = #tpu.pipeline_mode<synchronous>, transform_indices = @transform_11, window_bounds = array<i64: 1, 32>}, {pipeline_mode = #tpu.pipeline_mode<synchronous>, transform_indices = @transform_12, window_bounds = array<i64: 32, 32>}, {pipeline_mode = #tpu.pipeline_mode<synchronous>, transform_indices = @transform_13, window_bounds = array<i64: 1, 32>}, {pipeline_mode = #tpu.pipeline_mode<synchronous>, transform_indices = @transform_14, window_bounds = array<i64: 1, 32>}, {pipeline_mode = #tpu.pipeline_mode<synchronous>, transform_indices = @transform_15, window_bounds = array<i64: 1, 32>}, {transform_indices = @transform_16, window_bounds = array<i64: 1, 8, 32>}, {transform_indices = @transform_17, window_bounds = array<i64: 1, 8, 32>}]} {
    %c0 = arith.constant 0 : index
    %c0_0 = arith.constant 0 : index
    %c0_1 = arith.constant 0 : index
    %0 = vector.load %arg1[%c0, %c0_0, %c0_1] : memref<1x8x32xf32, #tpu.memory_space<vmem>>, vector<1x8x32xf32>
    %1 = vector.shape_cast %0 : vector<1x8x32xf32> to vector<8x32xf32>
    %c0_2 = arith.constant 0 : index
    %c0_3 = arith.constant 0 : index
    %c0_4 = arith.constant 0 : index
    %2 = vector.load %arg2[%c0_2, %c0_3, %c0_4] : memref<1x8x32xf32, #tpu.memory_space<vmem>>, vector<1x8x32xf32>
    %3 = vector.shape_cast %2 : vector<1x8x32xf32> to vector<8x32xf32>
    %c0_5 = arith.constant 0 : index
    %c0_6 = arith.constant 0 : index
    %4 = vector.load %arg3[%c0_5, %c0_6] : memref<32x96xf32, #tpu.memory_space<vmem>>, vector<32x96xf32>
    %cst = arith.constant dense<0.000000e+00> : vector<8x96xf32>
    %5 = tpu.matmul %1, %4, %cst {dimension_numbers = #tpu.dot_dimension_numbers<[1], [0], [0], [1], [0, 0, 1, 1], [], []>} : vector<8x32xf32>, vector<32x96xf32>, vector<8x96xf32> -> vector<8x96xf32>
    %c0_7 = arith.constant 0 : index
    %c0_8 = arith.constant 0 : index
    %6 = vector.load %arg4[%c0_7, %c0_8] : memref<1x96xf32, #tpu.memory_space<vmem>>, vector<1x96xf32>
    %7 = vector.broadcast %6 : vector<1x96xf32> to vector<8x96xf32>
    %8 = arith.addf %5, %7 : vector<8x96xf32>
    %9 = vector.shape_cast %8 : vector<8x96xf32> to vector<8x12x8xf32>
    %10 = tpu.transpose %9, [1, 0, 2] : vector<8x12x8xf32> -> vector<12x8x8xf32>
    %11 = vector.extract_strided_slice %10 {offsets = [0, 0, 0], sizes = [8, 8, 8], strides = [1, 1, 1]} : vector<12x8x8xf32> to vector<8x8x8xf32>
    %12 = vector.extract_strided_slice %10 {offsets = [8, 0, 0], sizes = [4, 8, 8], strides = [1, 1, 1]} : vector<12x8x8xf32> to vector<4x8x8xf32>
    %13 = vector.extract_strided_slice %11 {offsets = [0, 0, 0], sizes = [4, 8, 8], strides = [1, 1, 1]} : vector<8x8x8xf32> to vector<4x8x8xf32>
    %14 = vector.extract_strided_slice %11 {offsets = [4, 0, 0], sizes = [4, 8, 8], strides = [1, 1, 1]} : vector<8x8x8xf32> to vector<4x8x8xf32>
    "tpu.trace_start"() <{level = 10 : i32, message = "hqd,hkd->hqk"}> : () -> ()
    %cst_9 = arith.constant dense<0.000000e+00> : vector<4x8x8xf32>
    %15 = tpu.matmul %13, %14, %cst_9 {dimension_numbers = #tpu.dot_dimension_numbers<[2], [2], [1], [1], [0, 0, 0, 1, 1, 1], [0], [0]>} : vector<4x8x8xf32>, vector<4x8x8xf32>, vector<4x8x8xf32> -> vector<4x8x8xf32>
    "tpu.trace_stop"() : () -> ()
    %cst_10 = arith.constant dense<0xFF800000> : vector<4x8xf32>
    %16 = vector.multi_reduction <maximumf>, %15, %cst_10 [2] : vector<4x8x8xf32> to vector<4x8xf32>
    %17 = vector.shape_cast %16 : vector<4x8xf32> to vector<4x8x1xf32>
    %18 = vector.broadcast %17 : vector<4x8x1xf32> to vector<4x8x8xf32>
    %19 = arith.subf %15, %18 : vector<4x8x8xf32>
    %20 = math.exp %19 : vector<4x8x8xf32>
    %cst_11 = arith.constant dense<0.000000e+00> : vector<4x8xf32>
    %21 = vector.multi_reduction <add>, %20, %cst_11 [2] : vector<4x8x8xf32> to vector<4x8xf32>
    %22 = vector.shape_cast %21 : vector<4x8xf32> to vector<4x8x1xf32>
    %23 = tpu.reciprocal %22 : vector<4x8x1xf32> -> vector<4x8x1xf32>
    %24 = vector.broadcast %23 : vector<4x8x1xf32> to vector<4x8x8xf32>
    %25 = arith.mulf %20, %24 : vector<4x8x8xf32>
    "tpu.trace_start"() <{level = 10 : i32, message = "hqk,hkd->hqd"}> : () -> ()
    %cst_12 = arith.constant dense<0.000000e+00> : vector<4x8x8xf32>
    %26 = tpu.matmul %25, %12, %cst_12 {dimension_numbers = #tpu.dot_dimension_numbers<[2], [1], [1], [2], [0, 0, 0, 1, 1, 2], [0], [0]>} : vector<4x8x8xf32>, vector<4x8x8xf32>, vector<4x8x8xf32> -> vector<4x8x8xf32>
    "tpu.trace_stop"() : () -> ()
    %27 = tpu.transpose %26, [1, 0, 2] : vector<4x8x8xf32> -> vector<8x4x8xf32>
    %28 = vector.shape_cast %27 : vector<8x4x8xf32> to vector<8x32xf32>
    %c0_13 = arith.constant 0 : index
    %c0_14 = arith.constant 0 : index
    %29 = vector.load %arg5[%c0_13, %c0_14] : memref<32x32xf32, #tpu.memory_space<vmem>>, vector<32x32xf32>
    %cst_15 = arith.constant dense<0.000000e+00> : vector<8x32xf32>
    %30 = tpu.matmul %28, %29, %cst_15 {dimension_numbers = #tpu.dot_dimension_numbers<[1], [0], [0], [1], [0, 0, 1, 1], [], []>} : vector<8x32xf32>, vector<32x32xf32>, vector<8x32xf32> -> vector<8x32xf32>
    %c0_16 = arith.constant 0 : index
    %c0_17 = arith.constant 0 : index
    %31 = vector.load %arg6[%c0_16, %c0_17] : memref<1x32xf32, #tpu.memory_space<vmem>>, vector<1x32xf32>
    %32 = vector.broadcast %31 : vector<1x32xf32> to vector<8x32xf32>
    %33 = arith.addf %30, %32 : vector<8x32xf32>
    %34 = arith.addf %1, %33 : vector<8x32xf32>
    %cst_18 = arith.constant dense<0.000000e+00> : vector<8xf32>
    %35 = vector.multi_reduction <add>, %34, %cst_18 [1] : vector<8x32xf32> to vector<8xf32>
    %36 = vector.shape_cast %35 : vector<8xf32> to vector<8x1xf32>
    %cst_19 = arith.constant 3.200000e+01 : f32
    %37 = vector.broadcast %cst_19 : f32 to vector<8x1xf32>
    %38 = arith.divf %36, %37 : vector<8x1xf32>
    %39 = vector.broadcast %38 : vector<8x1xf32> to vector<8x32xf32>
    %40 = arith.subf %34, %39 : vector<8x32xf32>
    %41 = arith.mulf %40, %40 : vector<8x32xf32>
    %cst_20 = arith.constant dense<0.000000e+00> : vector<8xf32>
    %42 = vector.multi_reduction <add>, %41, %cst_20 [1] : vector<8x32xf32> to vector<8xf32>
    %43 = vector.shape_cast %42 : vector<8xf32> to vector<8x1xf32>
    %cst_21 = arith.constant 3.200000e+01 : f32
    %44 = vector.broadcast %cst_21 : f32 to vector<8x1xf32>
    %45 = arith.divf %43, %44 : vector<8x1xf32>
    %cst_22 = arith.constant 9.99999974E-6 : f32
    %46 = vector.broadcast %cst_22 : f32 to vector<8x1xf32>
    %47 = arith.addf %45, %46 : vector<8x1xf32>
    %48 = math.rsqrt %47 : vector<8x1xf32>
    %49 = vector.broadcast %48 : vector<8x1xf32> to vector<8x32xf32>
    %50 = arith.mulf %40, %49 : vector<8x32xf32>
    %c0_23 = arith.constant 0 : index
    %c0_24 = arith.constant 0 : index
    %51 = vector.load %arg7[%c0_23, %c0_24] : memref<1x32xf32, #tpu.memory_space<vmem>>, vector<1x32xf32>
    %52 = vector.broadcast %51 : vector<1x32xf32> to vector<8x32xf32>
    %53 = arith.mulf %50, %52 : vector<8x32xf32>
    %c0_25 = arith.constant 0 : index
    %c0_26 = arith.constant 0 : index
    %54 = vector.load %arg8[%c0_25, %c0_26] : memref<1x32xf32, #tpu.memory_space<vmem>>, vector<1x32xf32>
    %55 = vector.broadcast %54 : vector<1x32xf32> to vector<8x32xf32>
    %56 = arith.addf %53, %55 : vector<8x32xf32>
    %c0_27 = arith.constant 0 : index
    %c0_28 = arith.constant 0 : index
    %57 = vector.load %arg9[%c0_27, %c0_28] : memref<32x64xf32, #tpu.memory_space<vmem>>, vector<32x64xf32>
    %cst_29 = arith.constant dense<0.000000e+00> : vector<8x64xf32>
    %58 = tpu.matmul %56, %57, %cst_29 {dimension_numbers = #tpu.dot_dimension_numbers<[1], [0], [0], [1], [0, 0, 1, 1], [], []>} : vector<8x32xf32>, vector<32x64xf32>, vector<8x64xf32> -> vector<8x64xf32>
    %c0_30 = arith.constant 0 : index
    %c0_31 = arith.constant 0 : index
    %59 = vector.load %arg10[%c0_30, %c0_31] : memref<1x64xf32, #tpu.memory_space<vmem>>, vector<1x64xf32>
    %60 = vector.broadcast %59 : vector<1x64xf32> to vector<8x64xf32>
    %61 = arith.addf %58, %60 : vector<8x64xf32>
    %c0_32 = arith.constant 0 : index
    %c0_33 = arith.constant 0 : index
    %62 = vector.load %arg11[%c0_32, %c0_33] : memref<32x32xf32, #tpu.memory_space<vmem>>, vector<32x32xf32>
    %cst_34 = arith.constant dense<0.000000e+00> : vector<8x32xf32>
    %63 = tpu.matmul %3, %62, %cst_34 {dimension_numbers = #tpu.dot_dimension_numbers<[1], [0], [0], [1], [0, 0, 1, 1], [], []>} : vector<8x32xf32>, vector<32x32xf32>, vector<8x32xf32> -> vector<8x32xf32>
    %c0_35 = arith.constant 0 : index
    %c0_36 = arith.constant 0 : index
    %64 = vector.load %arg12[%c0_35, %c0_36] : memref<1x32xf32, #tpu.memory_space<vmem>>, vector<1x32xf32>
    %65 = vector.broadcast %64 : vector<1x32xf32> to vector<8x32xf32>
    %66 = arith.addf %63, %65 : vector<8x32xf32>
    %67 = vector.shape_cast %61 : vector<8x64xf32> to vector<8x8x8xf32>
    %68 = tpu.transpose %67, [1, 0, 2] : vector<8x8x8xf32> -> vector<8x8x8xf32>
    %69 = vector.shape_cast %66 : vector<8x32xf32> to vector<8x4x8xf32>
    %70 = tpu.transpose %69, [1, 0, 2] : vector<8x4x8xf32> -> vector<4x8x8xf32>
    %71 = vector.extract_strided_slice %68 {offsets = [0, 0, 0], sizes = [4, 8, 8], strides = [1, 1, 1]} : vector<8x8x8xf32> to vector<4x8x8xf32>
    %72 = vector.extract_strided_slice %68 {offsets = [4, 0, 0], sizes = [4, 8, 8], strides = [1, 1, 1]} : vector<8x8x8xf32> to vector<4x8x8xf32>
    "tpu.trace_start"() <{level = 10 : i32, message = "hqd,hkd->hqk"}> : () -> ()
    %cst_37 = arith.constant dense<0.000000e+00> : vector<4x8x8xf32>
    %73 = tpu.matmul %71, %72, %cst_37 {dimension_numbers = #tpu.dot_dimension_numbers<[2], [2], [1], [1], [0, 0, 0, 1, 1, 1], [0], [0]>} : vector<4x8x8xf32>, vector<4x8x8xf32>, vector<4x8x8xf32> -> vector<4x8x8xf32>
    "tpu.trace_stop"() : () -> ()
    %cst_38 = arith.constant dense<0xFF800000> : vector<4x8xf32>
    %74 = vector.multi_reduction <maximumf>, %73, %cst_38 [2] : vector<4x8x8xf32> to vector<4x8xf32>
    %75 = vector.shape_cast %74 : vector<4x8xf32> to vector<4x8x1xf32>
    %76 = vector.broadcast %75 : vector<4x8x1xf32> to vector<4x8x8xf32>
    %77 = arith.subf %73, %76 : vector<4x8x8xf32>
    %78 = math.exp %77 : vector<4x8x8xf32>
    %cst_39 = arith.constant dense<0.000000e+00> : vector<4x8xf32>
    %79 = vector.multi_reduction <add>, %78, %cst_39 [2] : vector<4x8x8xf32> to vector<4x8xf32>
    %80 = vector.shape_cast %79 : vector<4x8xf32> to vector<4x8x1xf32>
    %81 = tpu.reciprocal %80 : vector<4x8x1xf32> -> vector<4x8x1xf32>
    %82 = vector.broadcast %81 : vector<4x8x1xf32> to vector<4x8x8xf32>
    %83 = arith.mulf %78, %82 : vector<4x8x8xf32>
    "tpu.trace_start"() <{level = 10 : i32, message = "hqk,hkd->hqd"}> : () -> ()
    %cst_40 = arith.constant dense<0.000000e+00> : vector<4x8x8xf32>
    %84 = tpu.matmul %83, %70, %cst_40 {dimension_numbers = #tpu.dot_dimension_numbers<[2], [1], [1], [2], [0, 0, 0, 1, 1, 2], [0], [0]>} : vector<4x8x8xf32>, vector<4x8x8xf32>, vector<4x8x8xf32> -> vector<4x8x8xf32>
    "tpu.trace_stop"() : () -> ()
    %85 = tpu.transpose %84, [1, 0, 2] : vector<4x8x8xf32> -> vector<8x4x8xf32>
    %86 = vector.shape_cast %85 : vector<8x4x8xf32> to vector<8x32xf32>
    %c0_41 = arith.constant 0 : index
    %c0_42 = arith.constant 0 : index
    %87 = vector.load %arg13[%c0_41, %c0_42] : memref<32x32xf32, #tpu.memory_space<vmem>>, vector<32x32xf32>
    %cst_43 = arith.constant dense<0.000000e+00> : vector<8x32xf32>
    %88 = tpu.matmul %86, %87, %cst_43 {dimension_numbers = #tpu.dot_dimension_numbers<[1], [0], [0], [1], [0, 0, 1, 1], [], []>} : vector<8x32xf32>, vector<32x32xf32>, vector<8x32xf32> -> vector<8x32xf32>
    %c0_44 = arith.constant 0 : index
    %c0_45 = arith.constant 0 : index
    %89 = vector.load %arg14[%c0_44, %c0_45] : memref<1x32xf32, #tpu.memory_space<vmem>>, vector<1x32xf32>
    %90 = vector.broadcast %89 : vector<1x32xf32> to vector<8x32xf32>
    %91 = arith.addf %88, %90 : vector<8x32xf32>
    %92 = arith.addf %56, %91 : vector<8x32xf32>
    %cst_46 = arith.constant dense<0.000000e+00> : vector<8xf32>
    %93 = vector.multi_reduction <add>, %92, %cst_46 [1] : vector<8x32xf32> to vector<8xf32>
    %94 = vector.shape_cast %93 : vector<8xf32> to vector<8x1xf32>
    %cst_47 = arith.constant 3.200000e+01 : f32
    %95 = vector.broadcast %cst_47 : f32 to vector<8x1xf32>
    %96 = arith.divf %94, %95 : vector<8x1xf32>
    %97 = vector.broadcast %96 : vector<8x1xf32> to vector<8x32xf32>
    %98 = arith.subf %92, %97 : vector<8x32xf32>
    %99 = arith.mulf %98, %98 : vector<8x32xf32>
    %cst_48 = arith.constant dense<0.000000e+00> : vector<8xf32>
    %100 = vector.multi_reduction <add>, %99, %cst_48 [1] : vector<8x32xf32> to vector<8xf32>
    %101 = vector.shape_cast %100 : vector<8xf32> to vector<8x1xf32>
    %cst_49 = arith.constant 3.200000e+01 : f32
    %102 = vector.broadcast %cst_49 : f32 to vector<8x1xf32>
    %103 = arith.divf %101, %102 : vector<8x1xf32>
    %cst_50 = arith.constant 9.99999974E-6 : f32
    %104 = vector.broadcast %cst_50 : f32 to vector<8x1xf32>
    %105 = arith.addf %103, %104 : vector<8x1xf32>
    %106 = math.rsqrt %105 : vector<8x1xf32>
    %107 = vector.broadcast %106 : vector<8x1xf32> to vector<8x32xf32>
    %108 = arith.mulf %98, %107 : vector<8x32xf32>
    %c0_51 = arith.constant 0 : index
    %c0_52 = arith.constant 0 : index
    %109 = vector.load %arg15[%c0_51, %c0_52] : memref<1x32xf32, #tpu.memory_space<vmem>>, vector<1x32xf32>
    %110 = vector.broadcast %109 : vector<1x32xf32> to vector<8x32xf32>
    %111 = arith.mulf %108, %110 : vector<8x32xf32>
    %c0_53 = arith.constant 0 : index
    %c0_54 = arith.constant 0 : index
    %112 = vector.load %arg16[%c0_53, %c0_54] : memref<1x32xf32, #tpu.memory_space<vmem>>, vector<1x32xf32>
    %113 = vector.broadcast %112 : vector<1x32xf32> to vector<8x32xf32>
    %114 = arith.addf %111, %113 : vector<8x32xf32>
    %c0_55 = arith.constant 0 : index
    %c0_56 = arith.constant 0 : index
    %c0_57 = arith.constant 0 : index
    %115 = vector.load %arg17[%c0_55, %c0_56, %c0_57] : memref<1x8x32xf32, #tpu.memory_space<vmem>>, vector<1x8x32xf32>
    %116 = vector.shape_cast %115 : vector<1x8x32xf32> to vector<8x32xf32>
    %117 = vector.shape_cast %56 : vector<8x32xf32> to vector<1x8x32xf32>
    tpu.vector_store %arg17[%c0_55, %c0_56, %c0_57], %117 {strides = array<i32>} : memref<1x8x32xf32, #tpu.memory_space<vmem>>, vector<1x8x32xf32>,
    %c0_58 = arith.constant 0 : index
    %c0_59 = arith.constant 0 : index
    %c0_60 = arith.constant 0 : index
    %118 = vector.load %arg18[%c0_58, %c0_59, %c0_60] : memref<1x8x32xf32, #tpu.memory_space<vmem>>, vector<1x8x32xf32>
    %119 = vector.shape_cast %118 : vector<1x8x32xf32> to vector<8x32xf32>
    %120 = vector.shape_cast %114 : vector<8x32xf32> to vector<1x8x32xf32>
    tpu.vector_store %arg18[%c0_58, %c0_59, %c0_60], %120 {strides = array<i32>} : memref<1x8x32xf32, #tpu.memory_space<vmem>>, vector<1x8x32xf32>,
    return
  }
  func.func @transform_0(%arg0: i32) -> (i32, i32, i32) {
    %c0_i32 = arith.constant 0 : i32
    %c0_i32_0 = arith.constant 0 : i32
    %c0_i32_1 = arith.constant 0 : i32
    return %arg0, %c0_i32, %c0_i32_0 : i32, i32, i32
  }
  func.func @transform_1(%arg0: i32) -> (i32, i32, i32) {
    %c0_i32 = arith.constant 0 : i32
    %c0_i32_0 = arith.constant 0 : i32
    %c0_i32_1 = arith.constant 0 : i32
    return %arg0, %c0_i32, %c0_i32_0 : i32, i32, i32
  }
  func.func @transform_2(%arg0: i32) -> (i32, i32) {
    %c0_i32 = arith.constant 0 : i32
    %c0_i32_0 = arith.constant 0 : i32
    %c0_i32_1 = arith.constant 0 : i32
    return %c0_i32, %c0_i32_0 : i32, i32
  }
  func.func @transform_3(%arg0: i32) -> (i32, i32) {
    %c0_i32 = arith.constant 0 : i32
    %c0_i32_0 = arith.constant 0 : i32
    %c0_i32_1 = arith.constant 0 : i32
    return %c0_i32, %c0_i32_0 : i32, i32
  }
  func.func @transform_4(%arg0: i32) -> (i32, i32) {
    %c0_i32 = arith.constant 0 : i32
    %c0_i32_0 = arith.constant 0 : i32
    %c0_i32_1 = arith.constant 0 : i32
    return %c0_i32, %c0_i32_0 : i32, i32
  }
  func.func @transform_5(%arg0: i32) -> (i32, i32) {
    %c0_i32 = arith.constant 0 : i32
    %c0_i32_0 = arith.constant 0 : i32
    %c0_i32_1 = arith.constant 0 : i32
    return %c0_i32, %c0_i32_0 : i32, i32
  }
  func.func @transform_6(%arg0: i32) -> (i32, i32) {
    %c0_i32 = arith.constant 0 : i32
    %c0_i32_0 = arith.constant 0 : i32
    %c0_i32_1 = arith.constant 0 : i32
    return %c0_i32, %c0_i32_0 : i32, i32
  }
  func.func @transform_7(%arg0: i32) -> (i32, i32) {
    %c0_i32 = arith.constant 0 : i32
    %c0_i32_0 = arith.constant 0 : i32
    %c0_i32_1 = arith.constant 0 : i32
    return %c0_i32, %c0_i32_0 : i32, i32
  }
  func.func @transform_8(%arg0: i32) -> (i32, i32) {
    %c0_i32 = arith.constant 0 : i32
    %c0_i32_0 = arith.constant 0 : i32
    %c0_i32_1 = arith.constant 0 : i32
    return %c0_i32, %c0_i32_0 : i32, i32
  }
  func.func @transform_9(%arg0: i32) -> (i32, i32) {
    %c0_i32 = arith.constant 0 : i32
    %c0_i32_0 = arith.constant 0 : i32
    %c0_i32_1 = arith.constant 0 : i32
    return %c0_i32, %c0_i32_0 : i32, i32
  }
  func.func @transform_10(%arg0: i32) -> (i32, i32) {
    %c0_i32 = arith.constant 0 : i32
    %c0_i32_0 = arith.constant 0 : i32
    %c0_i32_1 = arith.constant 0 : i32
    return %c0_i32, %c0_i32_0 : i32, i32
  }
  func.func @transform_11(%arg0: i32) -> (i32, i32) {
    %c0_i32 = arith.constant 0 : i32
    %c0_i32_0 = arith.constant 0 : i32
    %c0_i32_1 = arith.constant 0 : i32
    return %c0_i32, %c0_i32_0 : i32, i32
  }
  func.func @transform_12(%arg0: i32) -> (i32, i32) {
    %c0_i32 = arith.constant 0 : i32
    %c0_i32_0 = arith.constant 0 : i32
    %c0_i32_1 = arith.constant 0 : i32
    return %c0_i32, %c0_i32_0 : i32, i32
  }
  func.func @transform_13(%arg0: i32) -> (i32, i32) {
    %c0_i32 = arith.constant 0 : i32
    %c0_i32_0 = arith.constant 0 : i32
    %c0_i32_1 = arith.constant 0 : i32
    return %c0_i32, %c0_i32_0 : i32, i32
  }
  func.func @transform_14(%arg0: i32) -> (i32, i32) {
    %c0_i32 = arith.constant 0 : i32
    %c0_i32_0 = arith.constant 0 : i32
    %c0_i32_1 = arith.constant 0 : i32
    return %c0_i32, %c0_i32_0 : i32, i32
  }
  func.func @transform_15(%arg0: i32) -> (i32, i32) {
    %c0_i32 = arith.constant 0 : i32
    %c0_i32_0 = arith.constant 0 : i32
    %c0_i32_1 = arith.constant 0 : i32
    return %c0_i32, %c0_i32_0 : i32, i32
  }
  func.func @transform_16(%arg0: i32) -> (i32, i32, i32) {
    %c0_i32 = arith.constant 0 : i32
    %c0_i32_0 = arith.constant 0 : i32
    %c0_i32_1 = arith.constant 0 : i32
    return %arg0, %c0_i32, %c0_i32_0 : i32, i32, i32
  }
  func.func @transform_17(%arg0: i32) -> (i32, i32, i32) {
    %c0_i32 = arith.constant 0 : i32
    %c0_i32_0 = arith.constant 0 : i32
    %c0_i32_1 = arith.constant 0 : i32
    return %arg0, %c0_i32, %c0_i32_0 : i32, i32, i32
  }
}

</mosaic_0001>

<bundles_post_ra>
// kernel: tpu_custom_call.1
= control target key start
LH: loop header
LB: loop body
LE: loop exit
PB: predicated region body
PF: predicated region fallthrough
CT: control target
= control target key end

     0   :  { %s5427_s0 = inlined_call_operand.hbm [shape: f32[2,8,32], index: 0, kind: input, shape index: {}]   ;;  %s5428_s1 = inlined_call_operand.hbm [shape: f32[2,8,32], index: 1, kind: input, shape index: {}]   ;;  %s5429_s2 = inlined_call_operand.hbm [shape: f32[32,96], index: 2, kind: input, shape index: {}]   ;;  %s5430_s3 = inlined_call_operand.vmem [shape: f32[1,96], index: 3, kind: input, shape index: {}]   ;;  %s5431_s4 = inlined_call_operand.hbm [shape: f32[32,32], index: 4, kind: input, shape index: {}]   ;;  %s5432_s5 = inlined_call_operand.vmem [shape: f32[1,32], index: 5, kind: input, shape index: {}]   ;;  %s5433_s6 = inlined_call_operand.vmem [shape: f32[1,32], index: 6, kind: input, shape index: {}]   ;;  %s5434_s7 = inlined_call_operand.vmem [shape: f32[1,32], index: 7, kind: input, shape index: {}]   ;;  %s5435_s8 = inlined_call_operand.hbm [shape: f32[32,64], index: 8, kind: input, shape index: {}]   ;;  %s5436_s9 = inlined_call_operand.vmem [shape: f32[1,64], index: 9, kind: input, shape index: {}]   ;;  %s5437_s10 = inlined_call_operand.vmem [shape: f32[32,32], index: 10, kind: input, shape index: {}]   ;;  %s5438_s11 = inlined_call_operand.vmem [shape: f32[1,32], index: 11, kind: input, shape index: {}]   ;;  %s5439_s12 = inlined_call_operand.hbm [shape: f32[32,32], index: 12, kind: input, shape index: {}]   ;;  %s5440_s13 = inlined_call_operand.vmem [shape: f32[1,32], index: 13, kind: input, shape index: {}]   ;;  %s5441_s14 = inlined_call_operand.vmem [shape: f32[1,32], index: 14, kind: input, shape index: {}]   ;;  %s5442_s15 = inlined_call_operand.vmem [shape: f32[1,32], index: 15, kind: input, shape index: {}]   ;;  %s5443_s16 = inlined_call_operand.hbm [shape: f32[2,8,32], index: 16, kind: output, shape index: {0}]   ;;  %s5444_s17 = inlined_call_operand.hbm [shape: f32[2,8,32], index: 17, kind: output, shape index: {1}]  }
   0x1   :  { %5462 = sst [smem:[#allocation26_spill]] %s5427_s0 }
   0x2   :  { %5463 = sst [smem:[#allocation27_spill]] %s5428_s1 }
   0x3   :  { %5464 = sst [smem:[#allocation28_spill]] %s5429_s2 }
   0x4   :  { %5465 = sst [smem:[#allocation29_spill]] %s5431_s4 }
   0x5   :  { %5466 = sst [smem:[#allocation30_spill]] %s5435_s8 }
   0x6   :  { %5467 = sst [smem:[#allocation31_spill]] %s5436_s9 }
   0x7   :  { %5468 = sst [smem:[#allocation32_spill]] %s5438_s11 }
   0x8   :  { %5469 = sst [smem:[#allocation33_spill]] %s5439_s12 }
   0x9   :  { %5470 = sst [smem:[#allocation34_spill]] %s5440_s13 }
   0xa   :  { %5471 = sst [smem:[#allocation35_spill]] %s5441_s14 }
   0xb   :  { %5472 = sst [smem:[#allocation36_spill]] %s5442_s15 }
   0xc   :  { %5473 = sst [smem:[#allocation37_spill]] %s5443_s16 }
   0xd   :  { %5474 = sst [smem:[#allocation38_spill]] %s5444_s17 }
   0xe   :  { %23 = vsyncpa [#allocation3], 0 }
   0xf   :  { %25 = vsyncpa [#allocation3 + $0x1], 0 }
  0x10   :  { %26 = vsyncpa [#allocation6], 0 }
  0x11   :  { %28 = vsyncpa [#allocation6 + $0x1], 0 }
  0x12   :  { %29 = vsyncpa [#allocation9], 0 }
  0x13   :  { %30 = vsyncpa [#allocation12], 0 }
  0x14   :  { %31 = vsyncpa [#allocation4], 0 }
  0x15   :  { %33 = vsyncpa [#allocation4 + $0x1], 0 }
  0x16   :  { %34 = vsyncpa [#allocation15], 0 }
  0x17   :  { %36 = vsyncpa [#allocation15 + $0x1], 0  ;;  %s4689_s24 = smov 0   ;;  %s4691_s25 = smov 0  }
  0x18   :  { %s4693_s26 = smov 0   ;;  %s4695_s27 = smov 0  }
  0x19 LB: > { %5475 = sst [smem:[#allocation23_spill]] %s4564_s26  ;;  %s4570_s28 = smov [#allocation7]   ;;  %s4568_s27 = sphi %s4695_s27, %s5516_s27   ;;  %s4564_s26 = sphi %s4693_s26, %s5518_s26   ;;  %s4560_s25 = sphi %s4691_s25, %s5520_s25   ;;  %s4556_s24 = sphi %s4689_s24, %s5519_s24  }
  0x1a   : > { %s457_s29 = sshll.u32 %s4570_s28, 4  ;;  %s4710_s0 = sadd.s32 4294967295, %s4568_s27   ;;  %s4715_s29 = int_to_ptr.vmem [resolvable:$true] %s457_s29 }
  0x1b   : > { %p3819_p0 = scmp.ge.s32.totalorder %s4568_s27, 1  ;;  %p5449_p1 = scmp.eq.s32.totalorder %s4710_s0, 0 }
  0x1c   : > { %p445_p2 = scmp.lt.s32.totalorder %s4568_s27, 3  ;;  %s4571_s18 = smov [#allocation8]  }
  0x1d   : > { %s473_s19 = sshll.u32 %s4571_s18, 4  ;;  %s4572_s20 = smov [#allocation10]   ;;  %s4730_s19 = int_to_ptr.vmem [resolvable:$true] %s473_s19 }
  0x1e   : > { %p4717_p3 = pnand %p3819_p0, %p445_p2  ;;  %s495_s21 = sshll.u32 %s4572_s20, 4  ;;  %s4732_s21 = int_to_ptr.vmem [resolvable:$true] %s495_s21 }
  0x1f   : > { %s5478_s2 = sld [smem:[#allocation28_spill]] }
  0x20   : > { %s5476_s30 = scalar_select %p4717_p3, 1, 0 }
  0x21   : > { %p4152_p5 = pneg %p4717_p3 }
  0x23   : > { %p4726_p6 = pnand %p4152_p5, %p5449_p1 }
  0x25   : > { %s4282_s28 = scalar_lea.hbm %s5478_s2, 512  ;;  %p4742_p8 = pneg %p4726_p6 }
  0x26   : > { %p4283_p7 = scmp.ne.s32.totalorder %s5478_s2, %s4282_s28  ;;  %p4289_p11 = scmp.lt.u32.totalorder %s4282_s28, %s5478_s2 }
  0x28   : > { %p4285_p9 = pnand %p4742_p8, %p4283_p7 }
  0x2a   : > { %p4286_p10 = pneg %p4285_p9 }
  0x2c   : > { %p4291_p12 = pnand %p4289_p11, %p4286_p10 }
  0x2e   : > { %4294 = shalt.err (!%p4291_p12)
}
  0x2f   : > { %s4295_s15 = scalar_lea.vmem %s4715_s29, 512  ;;  %p4303_p5 = scmp.lt.s32.totalorder %s4715_s29, %s4715_s29 }
  0x30   : > { %p4296_p13 = scmp.ne.s32.totalorder %s4715_s29, %s4295_s15  ;;  %p4304_p4 = scmp.lt.s32.totalorder %s4295_s15, %s4295_s15 }
  0x32   : > { %p4298_p0 = pnand %p4296_p13, %p4742_p8  ;;  %p4305_p7 = por %p4304_p4, %p4303_p5 }
  0x34   : > { %p4299_p2 = pneg %p4298_p0 }
  0x36   : > { %p4306_p9 = pnand %p4305_p7, %p4299_p2 }
  0x38   : > { %4309 = shalt.err (!%p4306_p9)
}
  0x39   : > { %s4573_s17 = smov 128   ;;  %s4574_s14 = smov 8  }
  0x3a   : > { %4155 = dma.hbm_to_vmem [thread:$0]  (!%p4726_p6), %s5478_s2, 512, %s4715_s29, [#allocation6], %s4573_s17, %s4573_s17, %s4574_s14  }
  0x3b   : > { %s5480_s4 = sld [smem:[#allocation29_spill]] }
  0x41   : > { %s4310_s15 = scalar_lea.hbm %s5480_s4, 512 }
  0x42   : > { %p4311_p4 = scmp.ne.s32.totalorder %s5480_s4, %s4310_s15  ;;  %p4317_p12 = scmp.lt.u32.totalorder %s4310_s15, %s5480_s4 }
  0x44   : > { %p4313_p10 = pnand %p4311_p4, %p4742_p8 }
  0x46   : > { %p4314_p11 = pneg %p4313_p10 }
  0x48   : > { %p4319_p13 = pnand %p4317_p12, %p4314_p11 }
  0x4a   : > { %4322 = shalt.err (!%p4319_p13)
}
  0x4b   : > { %s4323_s29 = scalar_lea.vmem %s4730_s19, 512  ;;  %p4331_p7 = scmp.lt.s32.totalorder %s4730_s19, %s4730_s19 }
  0x4c   : > { %p4324_p0 = scmp.ne.s32.totalorder %s4730_s19, %s4323_s29  ;;  %p4332_p9 = scmp.lt.s32.totalorder %s4323_s29, %s4323_s29 }
  0x4e   : > { %p4326_p2 = pnand %p4324_p0, %p4742_p8  ;;  %p4333_p4 = por %p4332_p9, %p4331_p7 }
  0x50   : > { %p4327_p5 = pneg %p4326_p2 }
  0x52   : > { %p4334_p10 = pnand %p4333_p4, %p4327_p5 }
  0x54   : > { %4337 = shalt.err (!%p4334_p10)
}
  0x55   : > { %4158 = dma.hbm_to_vmem [thread:$0]  (!%p4726_p6), %s5480_s4, 512, %s4730_s19, [#allocation9], %s4573_s17, %s4573_s17, %s4574_s14  }
  0x56   : > { %s5481_s8 = sld [smem:[#allocation30_spill]] }
  0x5c   : > { %s4338_s22 = scalar_lea.hbm %s5481_s8, 512 }
  0x5d   : > { %p4339_p11 = scmp.ne.s32.totalorder %s5481_s8, %s4338_s22  ;;  %p4345_p0 = scmp.lt.u32.totalorder %s4338_s22, %s5481_s8 }
  0x5f   : > { %p4341_p12 = pnand %p4339_p11, %p4742_p8 }
  0x61   : > { %p4342_p13 = pneg %p4341_p12 }
  0x63   : > { %p4347_p2 = pnand %p4345_p0, %p4342_p13 }
  0x65   : > { %4350 = shalt.err (!%p4347_p2)
}
  0x66   : > { %s4351_s19 = scalar_lea.vmem %s4732_s21, 512  ;;  %p4359_p4 = scmp.lt.s32.totalorder %s4732_s21, %s4732_s21 }
  0x67   : > { %p4352_p5 = scmp.ne.s32.totalorder %s4732_s21, %s4351_s19  ;;  %p4360_p10 = scmp.lt.s32.totalorder %s4351_s19, %s4351_s19 }
  0x69   : > { %p4354_p7 = pnand %p4352_p5, %p4742_p8  ;;  %p4361_p11 = por %p4360_p10, %p4359_p4 }
  0x6b   : > { %p4355_p9 = pneg %p4354_p7 }
  0x6d   : > { %p4362_p12 = pnand %p4361_p11, %p4355_p9 }
  0x6f   : > { %4365 = shalt.err (!%p4362_p12)
}
  0x70   : > { %4161 = dma.hbm_to_vmem [thread:$0]  (!%p4726_p6), %s5481_s8, 512, %s4732_s21, [#allocation9], %s4573_s17, %s4573_s17, %s4574_s14  }
  0x71   : > { %s4575_s11 = smov [#allocation11]   ;;  %s5482_s12 = sld [smem:[#allocation33_spill]] }
  0x72   : > { %s517_s13 = sshll.u32 %s4575_s11, 4  ;;  %s518_s13 = int_to_ptr.vmem [resolvable:$true] %s517_s13 }
  0x77   : > { %s4366_s23 = scalar_lea.hbm %s5482_s12, 512 }
  0x78   : > { %p4367_p13 = scmp.ne.s32.totalorder %s5482_s12, %s4366_s23  ;;  %p4373_p5 = scmp.lt.u32.totalorder %s4366_s23, %s5482_s12 }
  0x7a   : > { %p4369_p0 = pnand %p4367_p13, %p4742_p8 }
  0x7c   : > { %p4370_p2 = pneg %p4369_p0 }
  0x7e   : > { %p4375_p7 = pnand %p4373_p5, %p4370_p2 }
  0x80   : > { %4378 = shalt.err (!%p4375_p7)
}
  0x81   : > { %s4379_s21 = scalar_lea.vmem %s518_s13, 512  ;;  %p4387_p11 = scmp.lt.s32.totalorder %s518_s13, %s518_s13 }
  0x82   : > { %p4380_p9 = scmp.ne.s32.totalorder %s518_s13, %s4379_s21  ;;  %p4388_p12 = scmp.lt.s32.totalorder %s4379_s21, %s4379_s21 }
  0x84   : > { %p4382_p4 = pnand %p4380_p9, %p4742_p8  ;;  %p4389_p1 = por %p4388_p12, %p4387_p11 }
  0x86   : > { %p4383_p10 = pneg %p4382_p4 }
  0x88   : > { %p4390_p3 = pnand %p4389_p1, %p4383_p10 }
  0x8a   : > { %4393 = shalt.err (!%p4390_p3)
}
  0x8b   : > { %4164 = dma.hbm_to_vmem [thread:$0]  (!%p4726_p6), %s5482_s12, 512, %s518_s13, [#allocation12], %s4573_s17, %s4573_s17, %s4574_s14  }
  0x8c   : > { %s3818_s1 = sadd.s32 4294967294, %s4568_s27   ;;  %s4841_s18 = sadd.s32 1, %s4568_s27  }
  0x8d   : > { %5483 = sst [smem:[#allocation24_spill]] %s4841_s18  ;;  %s46_s11 = ssub.s32 %s4568_s27, %s4841_s18 }
  0x8e   : > { %s49_s16 = sadd.s32 1, %s4564_s26  ;;  %p47_p1 = scmp.eq.s32.totalorder %s46_s11, 0 }
  0x8f   : > { %p56_p3 = scmp.ne.s32.totalorder %s4564_s26, %s4560_s25  ;;  %p57_p8 = scmp.eq.s32.totalorder %s4568_s27, 0 }
  0x90   : > { %p62_p13 = scmp.ne.s32.totalorder %s4560_s25, %s4556_s24  ;;  %p5486_p2 = scmp.eq.s32.totalorder %s4710_s0, 0 }
  0x91   : > { %s4852_s22 = scalar_select %p47_p1, %s4564_s26, %s49_s16  }
  0x92   : > { %p4854_p0 = por %p57_p8, %p56_p3  ;;  %p4860_p6 = por %p5486_p2, %p62_p13 }
  0x93   : > { %5484 = sst [smem:[#allocation25_spill]] %s4852_s22  ;;  %p406_p5 = scmp.eq.s32.totalorder %s4710_s0, 1 }
  0x94   : > { %s5487_s17 = scalar_select %p4860_p6, 1, 0 }
  0x95   : > { %p412_p7 = scmp.eq.s32.totalorder %s3818_s1, 1  ;;  %p4183_p9 = scmp.lt.s32.totalorder %s4568_s27, 2 }
  0x96   : > { %s540_s14 = sand.u32 1, %s4564_s26   ;;  %p4867_p4 = por %p406_p5, %p56_p3 }
  0x97   : > { %p4871_p10 = por %p412_p7, %p62_p13  ;;  %s4875_s20 = sshll.u32 %s540_s14, 3 }
  0x98   : > { %s5488_s13 = scalar_select %p4867_p4, 1, 0 }
  0x99   : > { %s5489_s28 = scalar_select %p4871_p10, 1, 0 }
  0x9a   : > { %s3826_s15 = sshll.u32 %s4568_s27, 7  ;;  %s5490_s29 = sld [smem:[#allocation26_spill]] }
  0x9b   : > { %s544_s1 = scalar_lea.vmem [#allocation2], %s4875_s20  ;;  %p4888_p11 = pnand %p4183_p9, %p4854_p0 }
  0x9c   : > { %s551_s11 = sshll.u32 %s544_s1, 4  ;;  %s5492_s8 = sld [smem:[#allocation27_spill]]  ;;  %s4884_s11 = int_to_ptr.vmem [resolvable:$true] %s551_s11 }
  0x9d   : > { %s558_s21 = sand.u32 1, %s4568_s27   ;;  %s541_s12 = scalar_lea.sflag [#allocation3], %s540_s14 }
  0x9e   : > { %p4396_p1 = pneg %p4888_p11 }
  0xa0   : > { %s4881_s9 = scalar_lea.hbm %s5490_s29, %s3826_s15  ;;  %s4399_s26 = scalar_lea.hbm %s5490_s29, 256 }
  0xa1   : > { %s4394_s22 = scalar_lea.hbm %s4881_s9, 128  ;;  %p4400_p13 = scmp.lt.u32.totalorder %s4881_s9, %s5490_s29 }
  0xa2   : > { %s4895_s19 = scalar_lea.hbm %s5492_s8, %s3826_s15  ;;  %p4395_p12 = scmp.ne.s32.totalorder %s4881_s9, %s4394_s22 }
  0xa3   : > { %p4401_p0 = scmp.lt.u32.totalorder %s4399_s26, %s4394_s22  ;;  %p4403_p5 = scmp.lt.u32.totalorder %s4394_s22, %s4881_s9 }
  0xa4   : > { %p4397_p3 = pnand %p4396_p1, %p4395_p12 }
  0xa5   : > { %p4402_p2 = por %p4401_p0, %p4400_p13 }
  0xa6   : > { %p4398_p8 = pneg %p4397_p3 }
  0xa7   : > { %p4404_p7 = por %p4403_p5, %p4402_p2 }
  0xa9   : > { %p4405_p9 = pnand %p4404_p7, %p4398_p8 }
  0xab   : > { %4408 = shalt.err (!%p4405_p9)
}
  0xac   : > { %s4409_s4 = scalar_lea.vmem %s4884_s11, 128  ;;  %s4576_s14 = smov [#allocation2]  }
  0xad   : > { %p4410_p12 = scmp.ne.s32.totalorder %s4884_s11, %s4409_s4  ;;  %s4414_s15 = sshll.u32 %s4576_s14, 4  ;;  %s4415_s15 = int_to_ptr.vmem [resolvable:$false] %s4414_s15 }
  0xae   : > { %s4416_s18 = scalar_lea.vmem %s4415_s15, 256  ;;  %p4417_p4 = scmp.lt.s32.totalorder %s4884_s11, %s4415_s15 }
  0xaf   : > { %p4412_p3 = pnand %p4410_p12, %p4396_p1  ;;  %p4418_p13 = scmp.lt.s32.totalorder %s4416_s18, %s4409_s4 }
  0xb1   : > { %p4413_p10 = pneg %p4412_p3  ;;  %p4419_p0 = por %p4418_p13, %p4417_p4 }
  0xb3   : > { %p4420_p2 = pnand %p4419_p0, %p4413_p10 }
  0xb5   : > { %4423 = shalt.err (!%p4420_p2)
}
  0xb6   : > { %4168 = dma.hbm_to_vmem [thread:$0]  (!%p4888_p11), %s4881_s9, 128, %s4884_s11, %s541_s12  }
  0xb7   : > { %s562_s26 = scalar_lea.vmem [#allocation5], %s4875_s20  ;;  %s559_s23 = scalar_lea.sflag [#allocation6], %s558_s21 }
  0xb8   : > { %s569_s22 = sshll.u32 %s562_s26, 4  ;;  %s4424_s1 = scalar_lea.hbm %s4895_s19, 128  ;;  %s570_s22 = int_to_ptr.vmem [resolvable:$true] %s569_s22 }
  0xb9   : > { %p4425_p4 = scmp.ne.s32.totalorder %s4895_s19, %s4424_s1  ;;  %s4429_s14 = scalar_lea.hbm %s5492_s8, 256 }
  0xba   : > { %p4430_p5 = scmp.lt.u32.totalorder %s4895_s19, %s5492_s8  ;;  %p4431_p7 = scmp.lt.u32.totalorder %s4429_s14, %s4424_s1 }
  0xbb   : > { %p4427_p10 = pnand %p4425_p4, %p4396_p1  ;;  %p4433_p12 = scmp.lt.u32.totalorder %s4424_s1, %s4895_s19 }
  0xbc   : > { %p4432_p9 = por %p4431_p7, %p4430_p5 }
  0xbd   : > { %p4428_p8 = pneg %p4427_p10 }
  0xbe   : > { %p4434_p3 = por %p4433_p12, %p4432_p9 }
  0xc0   : > { %p4435_p13 = pnand %p4434_p3, %p4428_p8 }
  0xc2   : > { %4438 = shalt.err (!%p4435_p13)
}
  0xc3   : > { %s4439_s12 = scalar_lea.vmem %s570_s22, 128  ;;  %s4577_s20 = smov [#allocation5]  }
  0xc4   : > { %p4440_p0 = scmp.ne.s32.totalorder %s570_s22, %s4439_s12  ;;  %s4444_s9 = sshll.u32 %s4577_s20, 4  ;;  %s4445_s9 = int_to_ptr.vmem [resolvable:$false] %s4444_s9 }
  0xc5   : > { %s4446_s11 = scalar_lea.vmem %s4445_s9, 256  ;;  %p4447_p10 = scmp.lt.s32.totalorder %s570_s22, %s4445_s9 }
  0xc6   : > { %p4442_p2 = pnand %p4440_p0, %p4396_p1  ;;  %p4448_p6 = scmp.lt.s32.totalorder %s4446_s11, %s4439_s12 }
  0xc8   : > { %p4443_p4 = pneg %p4442_p2  ;;  %p4449_p5 = por %p4448_p6, %p4447_p10 }
  0xca   : > { %p4450_p7 = pnand %p4449_p5, %p4443_p4 }
  0xcc   : > { %4453 = shalt.err (!%p4450_p7)
}
  0xcd   : > { %4171 = dma.hbm_to_vmem [thread:$0]  (!%p4888_p11), %s4895_s19, 128, %s570_s22, %s559_s23  }
  0xce   : > { %p5493_p8 = scmp.ne.s32.totalorder %s5476_s30, 0 }
  0xcf   : > { %s4948_s21 = sand.u32 (!%p5493_p8), 1, %s4560_s25   ;;  %p5494_p6 = scmp.ne.s32.totalorder (!%p5493_p8), %s5487_s17, 0 }
  0xd0   : > { %578 = sbr.rel (%p5493_p8) target bundleno = 3833 (0xef9), region = 84  ;;  %s4951_s26 = sshll.u32 (!%p5493_p8), %s4948_s21, 3 }
  0xd1   : > { %s581_s1 = scalar_lea.sflag (!%p5493_p8), [#allocation3], %s4948_s21  ;;  %s584_s2 = scalar_lea.vmem (!%p5493_p8), [#allocation2], %s4951_s26 }
  0xd7   : > { %4527 = dma.done.wait (%p5494_p6), %s581_s1, 128  }
  0xd8   : > { %4529 = vsyncadd (%p5494_p6), %s581_s1, 4294967168  ;;  %s589_s30 = sand.u32 1, %s4710_s0   ;;  %s593_s19 = scalar_lea.vmem [#allocation5], %s4951_s26 }
  0xd9   : > { %s590_s16 = scalar_lea.sflag [#allocation6], %s589_s30 }
  0xda   : > { %4531 = dma.done.wait (%p5494_p6), %s590_s16, 128  }
  0xdb   : > { %4533 = vsyncadd (%p5494_p6), %s590_s16, 4294967168  ;;  %p5495_p11 = scmp.eq.s32.totalorder %s4710_s0, 0 }
  0xdd   : > { %4535 = dma.done.wait (%p5495_p11), [#allocation6], 512   ;;  %p5496_p1 = pmov %p5495_p11 }
  0xdf   : > { %4537 = vsyncadd (%p5496_p1), [#allocation6], 4294966784  ;;  %p5497_p9 = pmov %p5496_p1 }
  0xe0   : > { %p5498_p12 = pmov %p5496_p1 }
  0xe1   : > { %4539 = dma.done.wait (%p5497_p9), [#allocation9], 1024  }
  0xe2   : > { %4541 = vsyncadd (%p5498_p12), [#allocation9], 4294966272  ;;  %p5499_p3 = pmov %p5496_p1 }
  0xe3   : > { %p5500_p13 = pmov %p5496_p1 }
  0xe4   : > { %4543 = dma.done.wait (%p5499_p3), [#allocation12], 512  }
  0xe5   : > { %4545 = vsyncadd (%p5500_p13), [#allocation12], 4294966784  ;;  %v4578_v0 = vmov 0.0|0.0   ;;  %vm4579_vm0 = vmmov 0   ;;  %v4580_v1 = vmov 0.0   ;;  %v672_v2 = vld [vmem:[#allocation7] sm:$0xff]  ;;  %v796_v15 = vlaneseq }
  0xe6   : > { %4098 = vmatprep.subr.bf16.mxu0 %v4578_v0  ;;  %3971 = vmatprep.mubr.msk.f32.mxu0 %vm4579_vm0, %v4580_v1  ;;  %v673_v3 = vld [vmem:[#allocation7 + $0x8] sm:$0xff]  ;;  %v674_v4 = vld [vmem:[#allocation7 + $0x10] sm:$0xff]  ;;  %v675_v6 = vld [vmem:[#allocation7 + $0x18] sm:$0xff]  ;;  %vm683_vm1 = vcmask 261120   ;;  %s4581_s23 = smov 80   ;;  %s4582_s4 = smov 96  }
  0xe7   : > { %3974 = vmatprep.subr.mxu1 %v4580_v1  ;;  %3976 = vmatprep.mubr.msk.f32.mxu1 %vm4579_vm0, %v4580_v1  ;;  %v4099_v5 = vpack.c.bf16 %v673_v3, %v672_v2  ;;  %v4102_v7 = vpack.c.bf16 %v675_v6, %v674_v4  ;;  %v4984_v8 = vld [vmem:[%s584_s2] sm:$0xff]  ;;  %s4583_s14 = smov 72   ;;  %s4584_s15 = smov 88   ;;  %v4588_v13 = vmov 1983009808   ;;  %v797_v19 = vshrl.u32 %v796_v15, 7 }
  0xe8   : > { %v3838_v9 = vld [vmem:[%s5430_s3] ss:$0 sm:$0xff]  ;;  %s4585_s18 = smov 112   ;;  %s4586_s12 = smov 120   ;;  %v794_v14 = vunpack.c.l.s4 %v4588_v13  ;;  %v4589_v16 = vmov 1934713408  }
  0xe9   : > { %4100 = vmatpush3.bf16.msra.mxu0 %v4099_v5  ;;  %s5460_s20 = smov 104   ;;  %v858_v17 = vunpack.c.l.s4 %v4589_v16  ;;  %vm1199_vm2 = vcmask 64512   ;;  %s4590_s9 = smov 56   ;;  %vm1989_vm3 = vcmask 130048   ;;  %vm1991_vm4 = vcmask 195584  }
  0xea   : > { %4101 = vmatprep.subr.bf16.mxu0 %v4578_v0  ;;  %v795_v18 = vunpack.c.0.s8 %v794_v14  ;;  %s4591_s11 = smov 64   ;;  %s4592_s1 = smov 48  }
  0xeb   : > { %v859_v22 = vunpack.c.0.s8 %v858_v17  ;;  %s4593_s2 = smov 40   ;;  %s5458_s30 = smov 16  }
  0xec   : > { %v5010_v23 = vsub.s32 %v795_v18, %v797_v19  ;;  %s5457_s16 = smov 8   ;;  %s5456_s17 = smov 24  }
  0xed   : > { %4103 = vmatpush3.bf16.msra.mxu0 %v4102_v7  ;;  %v5012_v30 = vsub.s32 %v859_v22, %v797_v19  ;;  %s5508_s22 = sld [smem:[#allocation37_spill]]  ;;  %p5510_p2 = scmp.ne.s32.totalorder %s5488_s13, 0 }
  0xee   : > { %3994 = vmatprep.subr.mxu0 %v4580_v1 }
  0xf0   : > { %3972 = vmatmul.mubr.msk.f32.vlgmr.msra.gmra.mrb[0].mxu0 %vm683_vm1, %v4984_v8 }
  0xf1   : > { %3996 = vmatprep.mubr.msk.f32.mxu0 %vm4579_vm0, %v4580_v1 }
 0x1c3   : > { %v753_v10 = vpop.f32.mrb[0].mxu0 }
 0x1c4   : > { %v4994_v11 = vadd.f32 %v3838_v9, %v753_v10  ;;  %v3973_v12 = vpop.f32.mrb[1].mxu0 }
 0x1c6   : > { %773 = vrot.lane.b32.xlu1 %v4994_v11, %s4581_s23  ;;  %767 = vrot.lane.b32.xlu0 %v4994_v11, %s4582_s4 }
 0x1ca   : > { %776 = vrot.lane.b32.xlu1 %v4994_v11, %s4583_s14  ;;  %770 = vrot.lane.b32.xlu0 %v4994_v11, %s4584_s15 }
 0x1ce   : > { %761 = vrot.lane.b32.xlu1 %v4994_v11, %s4585_s18  ;;  %758 = vrot.lane.b32.xlu0 %v4994_v11, %s4586_s12 }
 0x1d2   : > { %764 = vrot.lane.b32.xlu0 %v4994_v11, %s5460_s20 }
 0x238   : > { %v774_v20 = vpop.permute.xlu1 %773  ;;  %v768_v21 = vpop.permute.xlu0 %767 }
 0x239   : > { %v823_v24 = vcombine.low %v768_v21, %v774_v20  ;;  %v824_v25 = vcombine.high %v768_v21, %v774_v20 }
 0x23b   : > { %v831_v31 = vrot.slane %v823_v24, %v5010_v23  ;;  %v838_v32 = vrot.slane %v824_v25, %v5010_v23 }
 0x23c   : > { %v777_v26 = vpop.permute.xlu1 %776  ;;  %v771_v27 = vpop.permute.xlu0 %770 }
 0x23d   : > { %v839_v28 = vcombine.low %v771_v27, %v777_v26  ;;  %v840_v29 = vcombine.high %v771_v27, %v777_v26 }
 0x23f   : > { %v847_v33 = vrot.slane %v839_v28, %v5010_v23  ;;  %v854_v34 = vrot.slane %v840_v29, %v5010_v23 }
 0x240   : > { %v759_v35 = vpop.permute.xlu0 %758  ;;  %v762_v40 = vpop.permute.xlu1 %761 }
 0x241   : > { %v887_v36 = vcombine.low %v831_v31, %v847_v33  ;;  %v888_v37 = vcombine.high %v831_v31, %v847_v33  ;;  %v903_v38 = vcombine.low %v838_v32, %v854_v34  ;;  %v904_v39 = vcombine.high %v838_v32, %v854_v34 }
 0x242   : > { %v791_v45 = vcombine.low %v4994_v11, %v762_v40  ;;  %v792_v46 = vcombine.high %v4994_v11, %v762_v40 }
 0x243   : > { %v895_v41 = vrot.slane %v887_v36, %v5012_v30  ;;  %v902_v42 = vrot.slane %v888_v37, %v5012_v30  ;;  %v911_v43 = vrot.slane %v903_v38, %v5012_v30  ;;  %v918_v44 = vrot.slane %v904_v39, %v5012_v30 }
 0x244   : > { %v765_v47 = vpop.permute.xlu0 %764  ;;  %v799_v58 = vrot.slane %v791_v45, %v5010_v23  ;;  %v806_v59 = vrot.slane %v792_v46, %v5010_v23 }
 0x245   : > { %v3841_v48 = vcombine.low %v895_v41, %v902_v42  ;;  %v3843_v49 = vcombine.high %v895_v41, %v902_v42  ;;  %v3845_v50 = vcombine.low %v911_v43, %v918_v44  ;;  %v3847_v51 = vcombine.high %v911_v43, %v918_v44 }
 0x246   : > { %v807_v52 = vcombine.low %v759_v35, %v765_v47  ;;  %v808_v53 = vcombine.high %v759_v35, %v765_v47 }
 0x247   : > { %v1010_v54 = vrot.slane %v3841_v48, %v5010_v23  ;;  %v1026_v55 = vrot.slane %v3843_v49, %v5010_v23  ;;  %v1042_v56 = vrot.slane %v3845_v50, %v5010_v23  ;;  %v1058_v57 = vrot.slane %v3847_v51, %v5010_v23 }
 0x248   : > { %v815_v60 = vrot.slane %v807_v52, %v5010_v23  ;;  %v822_v61 = vrot.slane %v808_v53, %v5010_v23 }
 0x249   : > { %v1075_v62 = vcombine.low %v1010_v54, %v1026_v55  ;;  %v1107_v63 = vcombine.low %v1042_v56, %v1058_v57  ;;  %v1076_v26 = vcombine.high %v1010_v54, %v1026_v55  ;;  %v1108_v27 = vcombine.high %v1042_v56, %v1058_v57 }
 0x24a   : > { %v855_v2 = vcombine.low %v799_v58, %v815_v60  ;;  %v856_v3 = vcombine.high %v799_v58, %v815_v60  ;;  %v871_v4 = vcombine.low %v806_v59, %v822_v61  ;;  %v872_v5 = vcombine.high %v806_v59, %v822_v61 }
 0x24b   : > { %v1083_v6 = vrot.slane %v1075_v62, %v5012_v30  ;;  %v1115_v7 = vrot.slane %v1107_v63, %v5012_v30  ;;  %v1090_v35 = vrot.slane %v1076_v26, %v5012_v30  ;;  %v1122_v36 = vrot.slane %v1108_v27, %v5012_v30 }
 0x24c   : > { %v863_v9 = vrot.slane %v855_v2, %v5012_v30  ;;  %v870_v10 = vrot.slane %v856_v3, %v5012_v30  ;;  %v879_v12 = vrot.slane %v871_v4, %v5012_v30  ;;  %v886_v13 = vrot.slane %v872_v5, %v5012_v30 }
 0x24d   : > { %v1127_v14 = vcombine.low %v1083_v6, %v1115_v7  ;;  %v1128_v34 = vcombine.high %v1083_v6, %v1115_v7  ;;  %v1129_v40 = vcombine.low %v1090_v35, %v1122_v36  ;;  %v1130_v42 = vcombine.high %v1090_v35, %v1122_v36 }
 0x24e   : > { %v3840_v15 = vcombine.low %v863_v9, %v870_v10  ;;  %v3842_v16 = vcombine.high %v863_v9, %v870_v10  ;;  %v3844_v17 = vcombine.low %v879_v12, %v886_v13  ;;  %v3846_v18 = vcombine.high %v879_v12, %v886_v13 }
 0x24f   : > { %3975 = vmatpush3.xpose.msk.msra.mxu1 %vm1199_vm2, %v1127_v14 }
 0x250   : > { %v1003_v19 = vrot.slane %v3840_v15, %v5010_v23  ;;  %v1019_v20 = vrot.slane %v3842_v16, %v5010_v23  ;;  %v1035_v21 = vrot.slane %v3844_v17, %v5010_v23  ;;  %v1051_v22 = vrot.slane %v3846_v18, %v5010_v23  ;;  %3979 = vmatprep.subr.mxu1 %v4580_v1 }
 0x252   : > { %v1059_v24 = vcombine.low %v1003_v19, %v1019_v20  ;;  %v1091_v25 = vcombine.low %v1035_v21, %v1051_v22  ;;  %v1060_v31 = vcombine.high %v1003_v19, %v1019_v20  ;;  %v1092_v32 = vcombine.high %v1035_v21, %v1051_v22 }
 0x254   : > { %v1067_v28 = vrot.slane %v1059_v24, %v5012_v30  ;;  %v1099_v29 = vrot.slane %v1091_v25, %v5012_v30  ;;  %v1074_v38 = vrot.slane %v1060_v31, %v5012_v30  ;;  %v1106_v39 = vrot.slane %v1092_v32, %v5012_v30 }
 0x256   : > { %v1123_v33 = vcombine.low %v1067_v28, %v1099_v29  ;;  %v1124_v37 = vcombine.high %v1067_v28, %v1099_v29  ;;  %v1125_v41 = vcombine.low %v1074_v38, %v1106_v39  ;;  %v1126_v43 = vcombine.high %v1074_v38, %v1106_v39 }
 0x258   : > { %3977 = vmatmul.mubr.msk.f32.vlgmr.msra.gmra.mrb[0].mxu1 %vm1199_vm2, %v1123_v33 }
 0x259   : > { %3980 = vmatpush3.xpose.msk.msra.mxu1 %vm1199_vm2, %v1128_v34  ;;  %3981 = vmatprep.mubr.msk.f32.mxu1 %vm4579_vm0, %v4580_v1 }
 0x25a   : > { %3984 = vmatprep.subr.mxu1 %v4580_v1 }
 0x25c   : > { %3982 = vmatmul.mubr.msk.f32.vlgmr.msra.gmra.mrb[2].mxu1 %vm1199_vm2, %v1124_v37 }
 0x25d   : > { %3985 = vmatpush3.xpose.msk.msra.mxu1 %vm1199_vm2, %v1129_v40  ;;  %3986 = vmatprep.mubr.msk.f32.mxu1 %vm4579_vm0, %v4580_v1 }
 0x25e   : > { %3989 = vmatprep.subr.mxu1 %v4580_v1 }
 0x260   : > { %3987 = vmatmul.mubr.msk.f32.vlgmr.msra.gmra.mrb[4].mxu1 %vm1199_vm2, %v1125_v41 }
 0x261   : > { %3990 = vmatpush3.xpose.msk.msra.mxu1 %vm1199_vm2, %v1130_v42  ;;  %3991 = vmatprep.mubr.msk.f32.mxu1 %vm4579_vm0, %v4580_v1 }
 0x262   : > { %3999 = vmatprep.subr.mxu1 %v4580_v1 }
 0x264   : > { %3992 = vmatmul.mubr.msk.f32.vlgmr.msra.gmra.mrb[6].mxu1 %vm1199_vm2, %v1126_v43 }
 0x265   : > { %4001 = vmatprep.mubr.msk.f32.mxu1 %vm4579_vm0, %v4580_v1 }
 0x32b   : > { %v1272_v44 = vpop.f32.mrb[0].mxu1 }
 0x32c   : > { %v3978_v45 = vpop.f32.mrb[1].mxu1  ;;  %v1504_v46 = vsel %vm1199_vm2, %v1272_v44, -inf }
 0x32d   : > { %1505 = vmax.xlane.f32.xlu1 %v1504_v46 }
 0x32f   : > { %v1348_v47 = vpop.f32.mrb[2].mxu1 }
 0x330   : > { %v3983_v48 = vpop.f32.mrb[3].mxu1  ;;  %v1507_v49 = vsel %vm1199_vm2, %v1348_v47, -inf }
 0x331   : > { %1508 = vmax.xlane.f32.xlu0 %v1507_v49 }
 0x333   : > { %v1424_v50 = vpop.f32.mrb[4].mxu1 }
 0x334   : > { %v3988_v51 = vpop.f32.mrb[5].mxu1  ;;  %v1510_v52 = vsel %vm1199_vm2, %v1424_v50, -inf }
 0x335   : > { %1511 = vmax.xlane.f32.xlu0 %v1510_v52 }
 0x337   : > { %v1500_v53 = vpop.f32.mrb[6].mxu1 }
 0x338   : > { %v3993_v54 = vpop.f32.mrb[7].mxu1  ;;  %v1513_v55 = vsel %vm1199_vm2, %v1500_v53, -inf }
 0x339   : > { %1514 = vmax.xlane.f32.xlu1 %v1513_v55 }
 0x34a   : > { %782 = vrot.lane.b32.xlu1 %v4994_v11, %s4590_s9  ;;  %s5459_s9 = scalar_lea.vmem [#allocation13], %s4951_s26 }
 0x34b   : > { %779 = vrot.lane.b32.xlu0 %v4994_v11, %s4591_s11 }
 0x3ba   : > { %v1506_v56 = vpop.xlane.xlu1 %1505 }
 0x3bb   : > { %v1516_v57 = vsub.f32 %v1272_v44, %v1506_v56 }
 0x3bd   : > { %v1520_v58 = vmul.f32 1.442695, %v1516_v57 }
 0x3be   : > { %v1509_v59 = vpop.xlane.xlu0 %1508 }
 0x3bf   : > { %4246 = vpow2.f32 %v1520_v58  ;;  %v1517_v60 = vsub.f32 %v1348_v47, %v1509_v59 }
 0x3c1   : > { %v1522_v61 = vmul.f32 1.442695, %v1517_v60 }
 0x3c2   : > { %v1512_v62 = vpop.xlane.xlu0 %1511 }
 0x3c3   : > { %4248 = vpow2.f32 %v1522_v61  ;;  %v1518_v63 = vsub.f32 %v1424_v50, %v1512_v62 }
 0x3c5   : > { %v1524_v2 = vmul.f32 1.442695, %v1518_v63 }
 0x3c6   : > { %v1515_v3 = vpop.xlane.xlu1 %1514  ;;  %v780_v16 = vpop.permute.xlu0 %779 }
 0x3c7   : > { %4250 = vpow2.f32 %v1524_v2  ;;  %v1519_v4 = vsub.f32 %v1500_v53, %v1515_v3 }
 0x3c9   : > { %v5074_v5 = vpop.eup %4246  ;;  %v1526_v6 = vmul.f32 1.442695, %v1519_v4 }
 0x3ca   : > { %v1528_v7 = vsel %vm1199_vm2, %v5074_v5, 0.0  ;;  %v783_v17 = vpop.permute.xlu1 %782 }
 0x3cb   : > { %4252 = vpow2.f32 %v1526_v6  ;;  %1529 = vadd.xlane.f32.xlu0 %v1528_v7 }
 0x3cd   : > { %v5078_v9 = vpop.eup %4248 }
 0x3ce   : > { %v1531_v10 = vsel %vm1199_vm2, %v5078_v9, 0.0 }
 0x3cf   : > { %1532 = vadd.xlane.f32.xlu1 %v1531_v10 }
 0x3d1   : > { %v5082_v12 = vpop.eup %4250 }
 0x3d2   : > { %v1534_v13 = vsel %vm1199_vm2, %v5082_v12, 0.0 }
 0x3d3   : > { %1535 = vadd.xlane.f32.xlu0 %v1534_v13 }
 0x3d5   : > { %v5086_v14 = vpop.eup %4252 }
 0x3d6   : > { %v1537_v15 = vsel %vm1199_vm2, %v5086_v14, 0.0 }
 0x3d7   : > { %1538 = vadd.xlane.f32.xlu1 %v1537_v15 }
 0x3e8   : > { %785 = vrot.lane.b32.xlu1 %v4994_v11, %s4592_s1  ;;  %s5509_s1 = scalar_lea.vmem [#allocation13], %s4951_s26 }
 0x3e9   : > { %788 = vrot.lane.b32.xlu0 %v4994_v11, %s4593_s2 }
 0x458   : > { %v1530_v18 = vpop.xlane.xlu0 %1529 }
 0x459   : > { %4254 = vrcp.f32 %v1530_v18 }
 0x45c   : > { %v1533_v19 = vpop.xlane.xlu1 %1532 }
 0x45d   : > { %4256 = vrcp.f32 %v1533_v19 }
 0x460   : > { %v1536_v20 = vpop.xlane.xlu0 %1535 }
 0x461   : > { %4258 = vrcp.f32 %v1536_v20 }
 0x463   : > { %v4255_v49 = vpop.eup %4254 }
 0x464   : > { %v789_v21 = vpop.permute.xlu0 %788  ;;  %v1539_v22 = vpop.xlane.xlu1 %1538  ;;  %v1544_v63 = vmul.f32 %v4255_v49, %v5074_v5  ;;  %v1993_v5 = vld [vmem:[#allocation8] sm:$0xff] }
 0x465   : > { %v943_v24 = vcombine.low %v783_v17, %v789_v21  ;;  %v944_v25 = vcombine.high %v783_v17, %v789_v21  ;;  %4260 = vrcp.f32 %v1539_v22 }
 0x467   : > { %v951_v29 = vrot.slane %v943_v24, %v5010_v23  ;;  %v958_v31 = vrot.slane %v944_v25, %v5010_v23  ;;  %v4257_v54 = vpop.eup %4256 }
 0x468   : > { %v786_v26 = vpop.permute.xlu1 %785  ;;  %v1545_v2 = vmul.f32 %v4257_v54, %v5078_v9  ;;  %v1994_v9 = vld [vmem:[#allocation8 + $0x8] sm:$0xff] }
 0x469   : > { %v927_v27 = vcombine.low %v780_v16, %v786_v26  ;;  %v928_v28 = vcombine.high %v780_v16, %v786_v26  ;;  %v4105_v10 = vpack.c.bf16 %v1994_v9, %v1993_v5 }
 0x46b   : > { %v935_v32 = vrot.slane %v927_v27, %v5010_v23  ;;  %v942_v11 = vrot.slane %v928_v28, %v5010_v23  ;;  %v4259_v57 = vpop.eup %4258 }
 0x46c   : > { %v1546_v6 = vmul.f32 %v4259_v57, %v5082_v12 }
 0x46d   : > { %v959_v33 = vcombine.low %v935_v32, %v951_v29  ;;  %v960_v34 = vcombine.high %v935_v32, %v951_v29  ;;  %v975_v35 = vcombine.low %v942_v11, %v958_v31  ;;  %v976_v36 = vcombine.high %v942_v11, %v958_v31 }
 0x46f   : > { %v967_v37 = vrot.slane %v959_v33, %v5012_v30  ;;  %v974_v38 = vrot.slane %v960_v34, %v5012_v30  ;;  %v983_v39 = vrot.slane %v975_v35, %v5012_v30  ;;  %v990_v40 = vrot.slane %v976_v36, %v5012_v30  ;;  %v4261_v62 = vpop.eup %4260  ;;  %v1995_v33 = vld [vmem:[#allocation8 + $0x10] sm:$0xff]  ;;  %v1996_v34 = vld [vmem:[#allocation8 + $0x18] sm:$0xff] }
 0x470   : > { %v1547_v7 = vmul.f32 %v4261_v62, %v5086_v14 }
 0x471   : > { %v1131_v41 = vcombine.low %v967_v37, %v974_v38  ;;  %v3848_v42 = vcombine.high %v967_v37, %v974_v38  ;;  %v1147_v43 = vcombine.low %v983_v39, %v990_v40  ;;  %v3849_v44 = vcombine.high %v983_v39, %v990_v40 }
 0x472   : > { %v4108_v39 = vpack.c.bf16 %v1996_v34, %v1995_v33  ;;  %v2193_v33 = vld [vmem:[%s5437_s10 + $0x8] sm:$0xff] }
 0x473   : > { %v1138_v45 = vrot.slane %v1131_v41, %v5010_v23  ;;  %v1146_v46 = vrot.slane %v3848_v42, %v5010_v23  ;;  %v1154_v47 = vrot.slane %v1147_v43, %v5010_v23  ;;  %v1162_v48 = vrot.slane %v3849_v44, %v5010_v23 }
 0x475   : > { %v1163_v50 = vcombine.low %v1138_v45, %v1146_v46  ;;  %v1179_v51 = vcombine.low %v1154_v47, %v1162_v48  ;;  %v1164_v52 = vcombine.high %v1138_v45, %v1146_v46  ;;  %v1180_v53 = vcombine.high %v1154_v47, %v1162_v48 }
 0x477   : > { %v1171_v55 = vrot.slane %v1163_v50, %v5012_v30  ;;  %v1187_v56 = vrot.slane %v1179_v51, %v5012_v30  ;;  %v1178_v58 = vrot.slane %v1164_v52, %v5012_v30  ;;  %v1194_v59 = vrot.slane %v1180_v53, %v5012_v30 }
 0x479   : > { %v1195_v60 = vcombine.low %v1171_v55, %v1187_v56  ;;  %v1196_v61 = vcombine.high %v1171_v55, %v1187_v56  ;;  %v1197_v3 = vcombine.low %v1178_v58, %v1194_v59  ;;  %v1198_v4 = vcombine.high %v1178_v58, %v1194_v59 }
 0x47b   : > { %3995 = vmatpush3.msra.mxu0 %v1195_v60  ;;  %4000 = vmatpush3.msra.mxu1 %v1196_v61 }
 0x47c   : > { %3997 = vmatmul.mubr.msk.f32.vlgmr.msra.gmra.mrb[2].mxu0 %vm1199_vm2, %v1544_v63  ;;  %4002 = vmatmul.mubr.msk.f32.vlgmr.msra.gmra.mrb[8].mxu1 %vm1199_vm2, %v1545_v2 }
 0x47d   : > { %4004 = vmatprep.subr.mxu0 %v4580_v1  ;;  %4009 = vmatprep.subr.mxu1 %v4580_v1 }
 0x47e   : > { %4005 = vmatpush3.msra.mxu0 %v1197_v3  ;;  %4010 = vmatpush3.msra.mxu1 %v1198_v4  ;;  %v3864_v4 = vld [vmem:[%s5432_s5] ss:$0 sm:$0xff] }
 0x47f   : > { %4006 = vmatprep.mubr.msk.f32.mxu0 %vm4579_vm0, %v4580_v1  ;;  %4011 = vmatprep.mubr.msk.f32.mxu1 %vm4579_vm0, %v4580_v1 }
 0x480   : > { %4007 = vmatmul.mubr.msk.f32.vlgmr.msra.gmra.mrb[4].mxu0 %vm1199_vm2, %v1546_v6  ;;  %4012 = vmatmul.mubr.msk.f32.vlgmr.msra.gmra.mrb[10].mxu1 %vm1199_vm2, %v1547_v7 }
 0x481   : > { %4104 = vmatprep.subr.bf16.mxu0 %v4578_v0  ;;  %4022 = vmatprep.mubr.msk.f32.mxu0 %vm4579_vm0, %v4580_v1 }
 0x482   : > { %4110 = vmatprep.subr.bf16.mxu1 %v4578_v0  ;;  %4033 = vmatprep.mubr.msk.f32.mxu1 %vm4579_vm0, %v4580_v1 }
 0x483   : > { %4106 = vmatpush3.bf16.msra.mxu0 %v4105_v10 }
 0x484   : > { %4107 = vmatprep.subr.bf16.mxu0 %v4578_v0 }
 0x487   : > { %4109 = vmatpush3.bf16.msra.mxu0 %v4108_v39  ;;  %v2194_v39 = vld [vmem:[%s5437_s10 + $0x10] sm:$0xff] }
 0x488   : > { %4116 = vmatprep.subr.bf16.mxu0 %v4578_v0 }
 0x54f   : > { %v1617_v12 = vpop.f32.mrb[2].mxu0  ;;  %v1690_v13 = vpop.f32.mrb[8].mxu1 }
 0x550   : > { %v3998_v14 = vpop.f32.mrb[3].mxu0  ;;  %v4003_v15 = vpop.f32.mrb[9].mxu1 }
 0x553   : > { %v1763_v16 = vpop.f32.mrb[4].mxu0  ;;  %v1836_v17 = vpop.f32.mrb[10].mxu1 }
 0x554   : > { %v1840_v18 = vcombine.low %v1617_v12, %v1763_v16  ;;  %v1841_v19 = vcombine.high %v1617_v12, %v1763_v16  ;;  %v1856_v20 = vcombine.low %v1690_v13, %v1836_v17  ;;  %v1857_v21 = vcombine.high %v1690_v13, %v1836_v17  ;;  %v4008_v22 = vpop.f32.mrb[5].mxu0  ;;  %v4013_v24 = vpop.f32.mrb[11].mxu1  ;;  %v2108_v17 = vld [vmem:[#allocation10] sm:$0xff] }
 0x556   : > { %v1848_v25 = vrot.slane %v1840_v18, %v5010_v23  ;;  %v1855_v26 = vrot.slane %v1841_v19, %v5010_v23  ;;  %v1864_v27 = vrot.slane %v1856_v20, %v5010_v23  ;;  %v1871_v28 = vrot.slane %v1857_v21, %v5010_v23  ;;  %v2109_v18 = vld [vmem:[#allocation10 + $0x8] sm:$0xff]  ;;  %v2110_v20 = vld [vmem:[#allocation10 + $0x10] sm:$0xff]  ;;  %v2111_v21 = vld [vmem:[#allocation10 + $0x18] sm:$0xff] }
 0x557   : > { %v4111_v19 = vpack.c.bf16 %v2109_v18, %v2108_v17 }
 0x558   : > { %v1872_v29 = vcombine.low %v1848_v25, %v1864_v27  ;;  %v1873_v31 = vcombine.high %v1848_v25, %v1864_v27  ;;  %v1888_v32 = vcombine.low %v1855_v26, %v1871_v28  ;;  %v1889_v11 = vcombine.high %v1855_v26, %v1871_v28  ;;  %v3866_v27 = vld [vmem:[%s5433_s6] ss:$0 sm:$0xff] }
 0x559   : > { %4112 = vmatpush3.bf16.msra.mxu1 %v4111_v19 }
 0x55a   : > { %v1880_v35 = vrot.slane %v1872_v29, %v5012_v30  ;;  %v1887_v36 = vrot.slane %v1873_v31, %v5012_v30  ;;  %v1896_v37 = vrot.slane %v1888_v32, %v5012_v30  ;;  %v1903_v38 = vrot.slane %v1889_v11, %v5012_v30  ;;  %4113 = vmatprep.subr.bf16.mxu1 %v4578_v0  ;;  %v3867_v29 = vld [vmem:[%s5434_s7] ss:$0 sm:$0xff] }
 0x55b   : > { %v2192_v11 = vld [vmem:[%s5437_s10] sm:$0xff] }
 0x55c   : > { %v1908_v40 = vcombine.low %v1880_v35, %v1887_v36  ;;  %v3862_v41 = vcombine.high %v1880_v35, %v1887_v36  ;;  %v1924_v42 = vcombine.low %v1896_v37, %v1903_v38  ;;  %v3863_v43 = vcombine.high %v1896_v37, %v1903_v38 }
 0x55d   : > { %v4117_v35 = vpack.c.bf16 %v2193_v33, %v2192_v11 }
 0x55e   : > { %v1915_v44 = vrot.slane %v1908_v40, %v5010_v23  ;;  %v1923_v45 = vrot.slane %v3862_v41, %v5010_v23  ;;  %v1931_v46 = vrot.slane %v1924_v42, %v5010_v23  ;;  %v1939_v47 = vrot.slane %v3863_v43, %v5010_v23  ;;  %v2195_v40 = vld [vmem:[%s5437_s10 + $0x18] sm:$0xff] }
 0x55f   : > { %v4120_v41 = vpack.c.bf16 %v2195_v40, %v2194_v39  ;;  %v671_v42 = vld [vmem:[%s593_s19] sm:$0xff]  ;;  %s3624_s19 = scalar_lea.sflag [#allocation4], %s4948_s21 }
 0x560   : > { %v1941_v48 = vcombine.high %v1915_v44, %v1923_v45  ;;  %v1957_v49 = vcombine.high %v1931_v46, %v1939_v47  ;;  %v1940_v50 = vcombine.low %v1915_v44, %v1923_v45  ;;  %v1956_v51 = vcombine.low %v1931_v46, %v1939_v47 }
 0x562   : > { %v1955_v52 = vrot.slane %v1941_v48, %v5012_v30  ;;  %v1971_v53 = vrot.slane %v1957_v49, %v5012_v30  ;;  %v1948_v54 = vrot.slane %v1940_v50, %v5012_v30  ;;  %v1964_v55 = vrot.slane %v1956_v51, %v5012_v30 }
 0x564   : > { %v1974_v56 = vcombine.low %v1955_v52, %v1971_v53  ;;  %v1973_v57 = vcombine.high %v1948_v54, %v1964_v55  ;;  %v1975_v58 = vcombine.high %v1955_v52, %v1971_v53  ;;  %v1972_v59 = vcombine.low %v1948_v54, %v1964_v55 }
 0x566   : > { %1981 = vrot.lane.b32.xlu0 %v1974_v56, %s5458_s30  ;;  %1977 = vrot.lane.b32.xlu1 %v1973_v57, %s5457_s16  ;;  %s5501_s30 = sld [smem:[#allocation31_spill]]  ;;  %s5507_s16 = sld [smem:[#allocation34_spill]] }
 0x56a   : > { %1985 = vrot.lane.b32.xlu1 %v1975_v58, %s5456_s17  ;;  %s3902_s17 = sshll.u32 %s4710_s0, 7 }
 0x56b   : > { %s5348_s11 = scalar_lea.hbm %s5508_s22, %s3902_s17 }
 0x56c   : > { %v3868_v34 = vld [vmem:[%s5501_s30] ss:$0 sm:$0xff] }
 0x5d8   : > { %v1978_v60 = vpop.permute.xlu1 %1977  ;;  %v1982_v61 = vpop.permute.xlu0 %1981 }
 0x5d9   : > { %v1988_v62 = vsel %vm1199_vm2, %v1972_v59, %v1978_v60 }
 0x5da   : > { %v1990_v2 = vsel %vm1989_vm3, %v1988_v62, %v1982_v61 }
 0x5dc   : > { %v1986_v63 = vpop.permute.xlu1 %1985 }
 0x5dd   : > { %v1992_v3 = vsel %vm1991_vm4, %v1990_v2, %v1986_v63 }
 0x5de   : > { %4023 = vmatmul.mubr.msk.f32.vlgmr.msra.gmra.mrb[6].mxu0 %vm683_vm1, %v1992_v3 }
 0x5df   : > { %4044 = vmatprep.mubr.msk.f32.mxu0 %vm4579_vm0, %v4580_v1  ;;  %4118 = vmatpush3.bf16.msra.mxu0 %v4117_v35 }
 0x5e0   : > { %4119 = vmatprep.subr.bf16.mxu0 %v4578_v0 }
 0x5e3   : > { %4121 = vmatpush3.bf16.msra.mxu0 %v4120_v41 }
 0x5e4   : > { %4057 = vmatprep.subr.mxu0 %v4580_v1 }
 0x5e6   : > { %4045 = vmatmul.mubr.msk.f32.vlgmr.msra.gmra.mrb[8].mxu0 %vm683_vm1, %v671_v42 }
 0x5e7   : > { %4059 = vmatprep.mubr.msk.f32.mxu0 %vm4579_vm0, %v4580_v1 }
 0x6b1   : > { %v2073_v6 = vpop.f32.mrb[6].mxu0 }
 0x6b2   : > { %v2074_v7 = vadd.f32 %v3864_v4, %v2073_v6  ;;  %v4024_v5 = vpop.f32.mrb[7].mxu0 }
 0x6b4   : > { %v2077_v9 = vadd.f32 %v2074_v7, %v4984_v8  ;;  %v4114_v8 = vpack.c.bf16 %v2111_v21, %v2110_v20 }
 0x6b6   : > { %v2078_v10 = vsel %vm683_vm1, %v2077_v9, 0.0  ;;  %4115 = vmatpush3.bf16.msra.mxu1 %v4114_v8 }
 0x6b7   : > { %2079 = vadd.xlane.f32.xlu0 %v2078_v10  ;;  %4047 = vmatprep.subr.mxu1 %v4580_v1 }
 0x744   : > { %v2080_v12 = vpop.xlane.xlu0 %2079 }
 0x745   : > { %v2082_v13 = vmul.f32 0.03125, %v2080_v12 }
 0x747   : > { %v2083_v14 = vsub.f32 %v2077_v9, %v2082_v13 }
 0x749   : > { %v2084_v15 = vmul.f32 %v2083_v14, %v2083_v14 }
 0x74b   : > { %v2085_v16 = vsel %vm683_vm1, %v2084_v15, 0.0 }
 0x74c   : > { %2086 = vadd.xlane.f32.xlu1 %v2085_v16 }
 0x7d9   : > { %v2087_v22 = vpop.xlane.xlu1 %2086 }
 0x7da   : > { %v2088_v24 = vmul.f32 0.03125, %v2087_v22 }
 0x7dc   : > { %v2089_v25 = vadd.f32 1e-05, %v2088_v24 }
 0x7de   : > { %4262 = vrsqrt.f32 %v2089_v25 }
 0x7e8   : > { %v4263_v26 = vpop.eup %4262 }
 0x7e9   : > { %v2091_v28 = vmul.f32 %v4263_v26, %v2083_v14 }
 0x7eb   : > { %v2099_v31 = vmul.f32 %v3866_v27, %v2091_v28 }
 0x7ed   : > { %v5169_v32 = vadd.f32 %v3867_v29, %v2099_v31 }
 0x7ef   : > { %4034 = vmatmul.mubr.msk.f32.vlgmr.msra.gmra.mrb[12].mxu1 %vm683_vm1, %v5169_v32  ;;  %3621 = vst.msk [vmem:[%s5459_s9] sm:$0xff] %vm683_vm1, %v5169_v32 }
 0x7f0   : > { %4049 = vmatprep.mubr.msk.f32.mxu1 %vm4579_vm0, %v4580_v1 }
 0x8c2   : > { %v2188_v36 = vpop.f32.mrb[12].mxu1 }
 0x8c3   : > { %v2189_v37 = vadd.f32 %v3868_v34, %v2188_v36  ;;  %v4035_v38 = vpop.f32.mrb[13].mxu1 }
 0x8c5   : > { %2289 = vrot.lane.b32.xlu1 %v2189_v37, %s4584_s15  ;;  %2286 = vrot.lane.b32.xlu0 %v2189_v37, %s4582_s4  ;;  %s5502_s15 = smov 104   ;;  %s5503_s4 = sld [smem:[#allocation32_spill]] }
 0x8c9   : > { %2295 = vrot.lane.b32.xlu1 %v2189_v37, %s4583_s14  ;;  %2292 = vrot.lane.b32.xlu0 %v2189_v37, %s4581_s23  ;;  %s5504_s14 = smov 16  }
 0x8cd   : > { %2280 = vrot.lane.b32.xlu1 %v2189_v37, %s4585_s18  ;;  %2277 = vrot.lane.b32.xlu0 %v2189_v37, %s4586_s12 }
 0x8d1   : > { %2283 = vrot.lane.b32.xlu0 %v2189_v37, %s5502_s15 }
 0x937   : > { %v2290_v43 = vpop.permute.xlu1 %2289  ;;  %v2287_v44 = vpop.permute.xlu0 %2286 }
 0x93b   : > { %v2296_v45 = vpop.permute.xlu1 %2295  ;;  %v2293_v46 = vpop.permute.xlu0 %2292 }
 0x93c   : > { %v2346_v47 = vcombine.low %v2290_v43, %v2296_v45  ;;  %v2347_v48 = vcombine.high %v2290_v43, %v2296_v45  ;;  %v2330_v49 = vcombine.low %v2287_v44, %v2293_v46  ;;  %v2331_v50 = vcombine.high %v2287_v44, %v2293_v46 }
 0x93e   : > { %v2354_v51 = vrot.slane %v2346_v47, %v5010_v23  ;;  %v2361_v52 = vrot.slane %v2347_v48, %v5010_v23  ;;  %v2338_v53 = vrot.slane %v2330_v49, %v5010_v23  ;;  %v2345_v54 = vrot.slane %v2331_v50, %v5010_v23 }
 0x93f   : > { %v2278_v55 = vpop.permute.xlu0 %2277  ;;  %v2281_v60 = vpop.permute.xlu1 %2280 }
 0x940   : > { %v2394_v56 = vcombine.low %v2338_v53, %v2354_v51  ;;  %v2395_v57 = vcombine.high %v2338_v53, %v2354_v51  ;;  %v2410_v58 = vcombine.low %v2345_v54, %v2361_v52  ;;  %v2411_v59 = vcombine.high %v2345_v54, %v2361_v52 }
 0x941   : > { %v2298_v3 = vcombine.low %v2189_v37, %v2281_v60  ;;  %v2299_v4 = vcombine.high %v2189_v37, %v2281_v60 }
 0x942   : > { %v2402_v61 = vrot.slane %v2394_v56, %v5012_v30  ;;  %v2409_v62 = vrot.slane %v2395_v57, %v5012_v30  ;;  %v2418_v63 = vrot.slane %v2410_v58, %v5012_v30  ;;  %v2425_v2 = vrot.slane %v2411_v59, %v5012_v30 }
 0x943   : > { %v2284_v6 = vpop.permute.xlu0 %2283  ;;  %v2306_v18 = vrot.slane %v2298_v3, %v5010_v23  ;;  %v2313_v19 = vrot.slane %v2299_v4, %v5010_v23 }
 0x944   : > { %v3873_v7 = vcombine.low %v2402_v61, %v2409_v62  ;;  %v3875_v5 = vcombine.high %v2402_v61, %v2409_v62  ;;  %v3877_v9 = vcombine.low %v2418_v63, %v2425_v2  ;;  %v3879_v10 = vcombine.high %v2418_v63, %v2425_v2  ;;  %v2272_v63 = vpop.f32.mrb[8].mxu0 }
 0x945   : > { %v2314_v12 = vcombine.low %v2278_v55, %v2284_v6  ;;  %v2315_v13 = vcombine.high %v2278_v55, %v2284_v6  ;;  %v4046_v2 = vpop.f32.mrb[9].mxu0 }
 0x946   : > { %v2449_v14 = vrot.slane %v3873_v7, %v5010_v23  ;;  %v2465_v15 = vrot.slane %v3875_v5, %v5010_v23  ;;  %v2481_v16 = vrot.slane %v3877_v9, %v5010_v23  ;;  %v2497_v17 = vrot.slane %v3879_v10, %v5010_v23 }
 0x947   : > { %v2322_v20 = vrot.slane %v2314_v12, %v5010_v23  ;;  %v2329_v21 = vrot.slane %v2315_v13, %v5010_v23 }
 0x948   : > { %v2514_v8 = vcombine.low %v2449_v14, %v2465_v15  ;;  %v2515_v22 = vcombine.high %v2449_v14, %v2465_v15  ;;  %v2546_v24 = vcombine.low %v2481_v16, %v2497_v17  ;;  %v2547_v25 = vcombine.high %v2481_v16, %v2497_v17  ;;  %v3870_v17 = vld [vmem:[%s5503_s4] ss:$0 sm:$0xff]  ;;  %s4597_s4 = smov [#allocation13]  }
 0x949   : > { %v2362_v26 = vcombine.low %v2306_v18, %v2322_v20  ;;  %v2363_v27 = vcombine.high %v2306_v18, %v2322_v20  ;;  %v2378_v28 = vcombine.low %v2313_v19, %v2329_v21  ;;  %v2379_v29 = vcombine.high %v2313_v19, %v2329_v21 }
 0x94a   : > { %v2522_v31 = vrot.slane %v2514_v8, %v5012_v30  ;;  %v2554_v11 = vrot.slane %v2546_v24, %v5012_v30  ;;  %v2529_v33 = vrot.slane %v2515_v22, %v5012_v30  ;;  %v2561_v34 = vrot.slane %v2547_v25, %v5012_v30 }
 0x94b   : > { %v2370_v35 = vrot.slane %v2362_v26, %v5012_v30  ;;  %v2377_v36 = vrot.slane %v2363_v27, %v5012_v30  ;;  %v2386_v37 = vrot.slane %v2378_v28, %v5012_v30  ;;  %v2393_v38 = vrot.slane %v2379_v29, %v5012_v30 }
 0x94c   : > { %v2566_v39 = vcombine.low %v2522_v31, %v2554_v11  ;;  %v2568_v40 = vcombine.low %v2529_v33, %v2561_v34  ;;  %v2567_v59 = vcombine.high %v2522_v31, %v2554_v11  ;;  %v2569_v61 = vcombine.high %v2529_v33, %v2561_v34 }
 0x94d   : > { %v3872_v41 = vcombine.low %v2370_v35, %v2377_v36  ;;  %v3874_v42 = vcombine.high %v2370_v35, %v2377_v36  ;;  %v3876_v43 = vcombine.low %v2386_v37, %v2393_v38  ;;  %v3878_v44 = vcombine.high %v2386_v37, %v2393_v38 }
 0x94e   : > { %4048 = vmatpush3.xpose.msk.msra.mxu1 %vm1199_vm2, %v2566_v39  ;;  %4058 = vmatpush3.xpose.msk.msra.mxu0 %vm1199_vm2, %v2568_v40  ;;  %v2273_v18 = vadd.f32 %v3870_v17, %v2272_v63 }
 0x94f   : > { %v2442_v45 = vrot.slane %v3872_v41, %v5010_v23  ;;  %v2458_v46 = vrot.slane %v3874_v42, %v5010_v23  ;;  %v2474_v47 = vrot.slane %v3876_v43, %v5010_v23  ;;  %v2490_v48 = vrot.slane %v3878_v44, %v5010_v23  ;;  %4052 = vmatprep.subr.mxu1 %v4580_v1 }
 0x950   : > { %4067 = vmatprep.subr.mxu0 %v4580_v1 }
 0x951   : > { %v2498_v49 = vcombine.low %v2442_v45, %v2458_v46  ;;  %v2499_v50 = vcombine.high %v2442_v45, %v2458_v46  ;;  %v2530_v51 = vcombine.low %v2474_v47, %v2490_v48  ;;  %v2531_v52 = vcombine.high %v2474_v47, %v2490_v48 }
 0x953   : > { %v2506_v53 = vrot.slane %v2498_v49, %v5012_v30  ;;  %v2538_v54 = vrot.slane %v2530_v51, %v5012_v30  ;;  %v2513_v55 = vrot.slane %v2499_v50, %v5012_v30  ;;  %v2545_v56 = vrot.slane %v2531_v52, %v5012_v30 }
 0x955   : > { %v2562_v57 = vcombine.low %v2506_v53, %v2538_v54  ;;  %v2564_v58 = vcombine.low %v2513_v55, %v2545_v56  ;;  %v2563_v60 = vcombine.high %v2506_v53, %v2538_v54  ;;  %v2565_v62 = vcombine.high %v2513_v55, %v2545_v56 }
 0x957   : > { %4050 = vmatmul.mubr.msk.f32.vlgmr.msra.gmra.mrb[14].mxu1 %vm1199_vm2, %v2562_v57  ;;  %4060 = vmatmul.mubr.msk.f32.vlgmr.msra.gmra.mrb[10].mxu0 %vm1199_vm2, %v2564_v58 }
 0x958   : > { %4053 = vmatpush3.xpose.msk.msra.mxu1 %vm1199_vm2, %v2567_v59  ;;  %4054 = vmatprep.mubr.msk.f32.mxu1 %vm4579_vm0, %v4580_v1 }
 0x959   : > { %4062 = vmatprep.subr.mxu1 %v4580_v1  ;;  %4069 = vmatprep.mubr.msk.f32.mxu0 %vm4579_vm0, %v4580_v1 }
 0x95b   : > { %4055 = vmatmul.mubr.msk.f32.vlgmr.msra.gmra.mrb[16].mxu1 %vm1199_vm2, %v2563_v60 }
 0x95c   : > { %4063 = vmatpush3.xpose.msk.msra.mxu1 %vm1199_vm2, %v2569_v61  ;;  %4064 = vmatprep.mubr.msk.f32.mxu1 %vm4579_vm0, %v4580_v1 }
 0x95d   : > { %4072 = vmatprep.subr.mxu1 %v4580_v1 }
 0x95f   : > { %4065 = vmatmul.mubr.msk.f32.vlgmr.msra.gmra.mrb[18].mxu1 %vm1199_vm2, %v2565_v62 }
 0x960   : > { %4074 = vmatprep.mubr.msk.f32.mxu1 %vm4579_vm0, %v4580_v1 }
 0xa2a   : > { %v2788_v3 = vpop.f32.mrb[14].mxu1  ;;  %v2940_v4 = vpop.f32.mrb[10].mxu0 }
 0xa2b   : > { %v4051_v6 = vpop.f32.mrb[15].mxu1  ;;  %v4061_v7 = vpop.f32.mrb[11].mxu0  ;;  %v3020_v5 = vsel %vm1199_vm2, %v2788_v3, -inf  ;;  %v3026_v16 = vsel %vm1199_vm2, %v2940_v4, -inf }
 0xa2c   : > { %3021 = vmax.xlane.f32.xlu1 %v3020_v5 }
 0xa2e   : > { %v2864_v9 = vpop.f32.mrb[16].mxu1 }
 0xa2f   : > { %v4056_v10 = vpop.f32.mrb[17].mxu1  ;;  %v3023_v12 = vsel %vm1199_vm2, %v2864_v9, -inf }
 0xa30   : > { %3024 = vmax.xlane.f32.xlu0 %v3023_v12 }
 0xa32   : > { %v3016_v13 = vpop.f32.mrb[18].mxu1 }
 0xa33   : > { %v4066_v14 = vpop.f32.mrb[19].mxu1  ;;  %v3029_v15 = vsel %vm1199_vm2, %v3016_v13, -inf }
 0xa34   : > { %3030 = vmax.xlane.f32.xlu1 %v3029_v15  ;;  %3027 = vmax.xlane.f32.xlu0 %v3026_v16 }
 0xa45   : > { %2574 = vrot.lane.b32.xlu1 %v2273_v18, %s4585_s18  ;;  %s5505_s18 = smov 8  }
 0xab9   : > { %v3022_v19 = vpop.xlane.xlu1 %3021 }
 0xaba   : > { %v3032_v20 = vsub.f32 %v2788_v3, %v3022_v19 }
 0xabc   : > { %v3036_v21 = vmul.f32 1.442695, %v3032_v20 }
 0xabd   : > { %v3025_v8 = vpop.xlane.xlu0 %3024 }
 0xabe   : > { %4264 = vpow2.f32 %v3036_v21  ;;  %v3033_v22 = vsub.f32 %v2864_v9, %v3025_v8 }
 0xac0   : > { %v3038_v24 = vmul.f32 1.442695, %v3033_v22 }
 0xac1   : > { %v3031_v25 = vpop.xlane.xlu1 %3030  ;;  %v3028_v26 = vpop.xlane.xlu0 %3027 }
 0xac2   : > { %4266 = vpow2.f32 %v3038_v24  ;;  %v3035_v27 = vsub.f32 %v3016_v13, %v3031_v25  ;;  %v3034_v28 = vsub.f32 %v2940_v4, %v3028_v26 }
 0xac4   : > { %v3042_v29 = vmul.f32 1.442695, %v3035_v27  ;;  %v3040_v31 = vmul.f32 1.442695, %v3034_v28 }
 0xac5   : > { %v2575_v40 = vpop.permute.xlu1 %2574 }
 0xac6   : > { %4268 = vpow2.f32 %v3042_v29  ;;  %v2580_v45 = vcombine.low %v2273_v18, %v2575_v40  ;;  %v2581_v46 = vcombine.high %v2273_v18, %v2575_v40 }
 0xac7   : > { %4270 = vpow2.f32 %v3040_v31 }
 0xac8   : > { %v4265_v11 = vpop.eup %4264  ;;  %v2588_v51 = vrot.slane %v2580_v45, %v5010_v23  ;;  %v2595_v52 = vrot.slane %v2581_v46, %v5010_v23 }
 0xac9   : > { %v3044_v33 = vsel %vm1199_vm2, %v4265_v11, 0.0 }
 0xaca   : > { %3045 = vadd.xlane.f32.xlu0 %v3044_v33  ;;  %v3508_v33 = vld [vmem:[#allocation11 + $0x8] sm:$0xff] }
 0xacc   : > { %v4267_v34 = vpop.eup %4266 }
 0xacd   : > { %v3047_v35 = vsel %vm1199_vm2, %v4267_v34, 0.0 }
 0xace   : > { %3048 = vadd.xlane.f32.xlu1 %v3047_v35 }
 0xad0   : > { %v5271_v36 = vpop.eup %4268 }
 0xad1   : > { %v5273_v37 = vpop.eup %4270  ;;  %v3053_v38 = vsel %vm1199_vm2, %v5271_v36, 0.0 }
 0xad2   : > { %3054 = vadd.xlane.f32.xlu1 %v3053_v38  ;;  %v3050_v39 = vsel %vm1199_vm2, %v5273_v37, 0.0 }
 0xad3   : > { %3051 = vadd.xlane.f32.xlu0 %v3050_v39 }
 0xae3   : > { %2577 = vrot.lane.b32.xlu1 %v2273_v18, %s5502_s15  ;;  %s3642_s15 = sshll.u32 %s5509_s1, 4  ;;  %s3643_s15 = int_to_ptr.vmem [resolvable:$true] %s3642_s15 }
 0xae4   : > { %s4454_s23 = scalar_lea.vmem %s3643_s15, 128 }
 0xae5   : > { %p4455_p0 = scmp.ne.s32.totalorder %s3643_s15, %s4454_s23 }
 0xae7   : > { %p4456_p4 = pnand %p4455_p0, %p5510_p2 }
 0xae9   : > { %2571 = vrot.lane.b32.xlu0 %v2273_v18, %s4586_s12  ;;  %s5506_s12 = smov 24   ;;  %p4457_p10 = pneg %p4456_p4 }
 0xb57   : > { %v3046_v42 = vpop.xlane.xlu0 %3045 }
 0xb58   : > { %4272 = vrcp.f32 %v3046_v42 }
 0xb5b   : > { %v3049_v41 = vpop.xlane.xlu1 %3048 }
 0xb5c   : > { %4274 = vrcp.f32 %v3049_v41 }
 0xb5f   : > { %v3055_v43 = vpop.xlane.xlu1 %3054 }
 0xb60   : > { %v3052_v44 = vpop.xlane.xlu0 %3051  ;;  %4276 = vrcp.f32 %v3055_v43 }
 0xb61   : > { %4278 = vrcp.f32 %v3052_v44 }
 0xb62   : > { %v4273_v13 = vpop.eup %4272 }
 0xb63   : > { %v2578_v47 = vpop.permute.xlu1 %2577  ;;  %v3060_v24 = vmul.f32 %v4273_v13, %v4265_v11  ;;  %v3507_v11 = vld [vmem:[#allocation11] sm:$0xff] }
 0xb64   : > { %v2572_v48 = vpop.permute.xlu0 %2571 }
 0xb65   : > { %v2596_v49 = vcombine.low %v2572_v48, %v2578_v47  ;;  %v2597_v50 = vcombine.high %v2572_v48, %v2578_v47 }
 0xb66   : > { %v4275_v17 = vpop.eup %4274 }
 0xb67   : > { %v2604_v53 = vrot.slane %v2596_v49, %v5010_v23  ;;  %v2611_v54 = vrot.slane %v2597_v50, %v5010_v23  ;;  %v3061_v25 = vmul.f32 %v4275_v17, %v4267_v34  ;;  %v4123_v34 = vpack.c.bf16 %v3508_v33, %v3507_v11 }
 0xb69   : > { %v2612_v55 = vcombine.low %v2588_v51, %v2604_v53  ;;  %v2613_v56 = vcombine.high %v2588_v51, %v2604_v53  ;;  %v2628_v57 = vcombine.low %v2595_v52, %v2611_v54  ;;  %v2629_v58 = vcombine.high %v2595_v52, %v2611_v54  ;;  %v3509_v53 = vld [vmem:[#allocation11 + $0x10] sm:$0xff]  ;;  %v3510_v54 = vld [vmem:[#allocation11 + $0x18] sm:$0xff] }
 0xb6a   : > { %v4277_v22 = vpop.eup %4276 }
 0xb6b   : > { %v2620_v59 = vrot.slane %v2612_v55, %v5012_v30  ;;  %v2627_v60 = vrot.slane %v2613_v56, %v5012_v30  ;;  %v2636_v61 = vrot.slane %v2628_v57, %v5012_v30  ;;  %v2643_v62 = vrot.slane %v2629_v58, %v5012_v30  ;;  %v4279_v26 = vpop.eup %4278 }
 0xb6c   : > { %v3063_v29 = vmul.f32 %v4277_v22, %v5271_v36  ;;  %v3062_v31 = vmul.f32 %v4279_v26, %v5273_v37 }
 0xb6d   : > { %v2648_v63 = vcombine.low %v2620_v59, %v2627_v60  ;;  %v3880_v2 = vcombine.high %v2620_v59, %v2627_v60  ;;  %v2664_v3 = vcombine.low %v2636_v61, %v2643_v62  ;;  %v3881_v4 = vcombine.high %v2636_v61, %v2643_v62 }
 0xb6e   : > { %v4126_v59 = vpack.c.bf16 %v3510_v54, %v3509_v53 }
 0xb6f   : > { %v2655_v6 = vrot.slane %v2648_v63, %v5010_v23  ;;  %v2663_v7 = vrot.slane %v3880_v2, %v5010_v23  ;;  %v2671_v5 = vrot.slane %v2664_v3, %v5010_v23  ;;  %v2679_v9 = vrot.slane %v3881_v4, %v5010_v23 }
 0xb71   : > { %v2680_v10 = vcombine.low %v2655_v6, %v2663_v7  ;;  %v2681_v12 = vcombine.high %v2655_v6, %v2663_v7  ;;  %v2696_v14 = vcombine.low %v2671_v5, %v2679_v9  ;;  %v2697_v15 = vcombine.high %v2671_v5, %v2679_v9 }
 0xb73   : > { %v2688_v16 = vrot.slane %v2680_v10, %v5012_v30  ;;  %v2704_v18 = vrot.slane %v2696_v14, %v5012_v30  ;;  %v2695_v19 = vrot.slane %v2681_v12, %v5012_v30  ;;  %v2711_v20 = vrot.slane %v2697_v15, %v5012_v30 }
 0xb75   : > { %v2712_v21 = vcombine.low %v2688_v16, %v2704_v18  ;;  %v2713_v8 = vcombine.high %v2688_v16, %v2704_v18  ;;  %v2714_v27 = vcombine.low %v2695_v19, %v2711_v20  ;;  %v2715_v28 = vcombine.high %v2695_v19, %v2711_v20 }
 0xb77   : > { %4068 = vmatpush3.msra.mxu0 %v2712_v21  ;;  %4073 = vmatpush3.msra.mxu1 %v2713_v8 }
 0xb78   : > { %4070 = vmatmul.mubr.msk.f32.vlgmr.msra.gmra.mrb[12].mxu0 %vm1199_vm2, %v3060_v24  ;;  %4075 = vmatmul.mubr.msk.f32.vlgmr.msra.gmra.mrb[20].mxu1 %vm1199_vm2, %v3061_v25  ;;  %v3896_v24 = vld [vmem:[%s5507_s16] ss:$0 sm:$0xff] }
 0xb79   : > { %4077 = vmatprep.subr.mxu0 %v4580_v1  ;;  %4082 = vmatprep.subr.mxu1 %v4580_v1 }
 0xb7a   : > { %4078 = vmatpush3.msra.mxu0 %v2714_v27  ;;  %4083 = vmatpush3.msra.mxu1 %v2715_v28 }
 0xb7b   : > { %4079 = vmatprep.mubr.msk.f32.mxu0 %vm4579_vm0, %v4580_v1  ;;  %4084 = vmatprep.mubr.msk.f32.mxu1 %vm4579_vm0, %v4580_v1 }
 0xb7c   : > { %4080 = vmatmul.mubr.msk.f32.vlgmr.msra.gmra.mrb[14].mxu0 %vm1199_vm2, %v3062_v31  ;;  %4085 = vmatmul.mubr.msk.f32.vlgmr.msra.gmra.mrb[22].mxu1 %vm1199_vm2, %v3063_v29 }
 0xb7d   : > { %4122 = vmatprep.subr.bf16.mxu0 %v4578_v0  ;;  %4095 = vmatprep.mubr.msk.f32.mxu0 %vm4579_vm0, %v4580_v1 }
 0xb7e   : > { %4124 = vmatpush3.bf16.msra.mxu0 %v4123_v34 }
 0xb7f   : > { %4125 = vmatprep.subr.bf16.mxu0 %v4578_v0 }
 0xb82   : > { %4127 = vmatpush3.bf16.msra.mxu0 %v4126_v59 }
 0xc4b   : > { %v3133_v35 = vpop.f32.mrb[12].mxu0  ;;  %v3206_v36 = vpop.f32.mrb[20].mxu1 }
 0xc4c   : > { %v4071_v37 = vpop.f32.mrb[13].mxu0  ;;  %v4076_v38 = vpop.f32.mrb[21].mxu1 }
 0xc4f   : > { %v3279_v39 = vpop.f32.mrb[14].mxu0  ;;  %v3352_v40 = vpop.f32.mrb[22].mxu1 }
 0xc50   : > { %v3356_v41 = vcombine.low %v3133_v35, %v3279_v39  ;;  %v3357_v42 = vcombine.high %v3133_v35, %v3279_v39  ;;  %v3372_v43 = vcombine.low %v3206_v36, %v3352_v40  ;;  %v3373_v44 = vcombine.high %v3206_v36, %v3352_v40  ;;  %v4081_v45 = vpop.f32.mrb[15].mxu0  ;;  %v4086_v46 = vpop.f32.mrb[23].mxu1 }
 0xc52   : > { %v3364_v1 = vrot.slane %v3356_v41, %v5010_v23  ;;  %v3371_v47 = vrot.slane %v3357_v42, %v5010_v23  ;;  %v3380_v48 = vrot.slane %v3372_v43, %v5010_v23  ;;  %v3387_v0 = vrot.slane %v3373_v44, %v5010_v23 }
 0xc54   : > { %v3388_v49 = vcombine.low %v3364_v1, %v3380_v48  ;;  %v3389_v50 = vcombine.high %v3364_v1, %v3380_v48  ;;  %v3404_v51 = vcombine.low %v3371_v47, %v3387_v0  ;;  %v3405_v52 = vcombine.high %v3371_v47, %v3387_v0 }
 0xc56   : > { %v3396_v55 = vrot.slane %v3388_v49, %v5012_v30  ;;  %v3403_v56 = vrot.slane %v3389_v50, %v5012_v30  ;;  %v3412_v57 = vrot.slane %v3404_v51, %v5012_v30  ;;  %v3419_v58 = vrot.slane %v3405_v52, %v5012_v30 }
 0xc58   : > { %v3424_v60 = vcombine.low %v3396_v55, %v3403_v56  ;;  %v3894_v61 = vcombine.high %v3396_v55, %v3403_v56  ;;  %v3440_v62 = vcombine.low %v3412_v57, %v3419_v58  ;;  %v3895_v63 = vcombine.high %v3412_v57, %v3419_v58 }
 0xc5a   : > { %v3431_v2 = vrot.slane %v3424_v60, %v5010_v23  ;;  %v3439_v3 = vrot.slane %v3894_v61, %v5010_v23  ;;  %v3447_v4 = vrot.slane %v3440_v62, %v5010_v23  ;;  %v3455_v6 = vrot.slane %v3895_v63, %v5010_v23 }
 0xc5c   : > { %v3457_v7 = vcombine.high %v3431_v2, %v3439_v3  ;;  %v3473_v5 = vcombine.high %v3447_v4, %v3455_v6  ;;  %v3456_v9 = vcombine.low %v3431_v2, %v3439_v3  ;;  %v3472_v10 = vcombine.low %v3447_v4, %v3455_v6 }
 0xc5e   : > { %v3471_v12 = vrot.slane %v3457_v7, %v5012_v30  ;;  %v3487_v13 = vrot.slane %v3473_v5, %v5012_v30  ;;  %v3464_v14 = vrot.slane %v3456_v9, %v5012_v30  ;;  %v3480_v15 = vrot.slane %v3472_v10, %v5012_v30 }
 0xc60   : > { %v3490_v16 = vcombine.low %v3471_v12, %v3487_v13  ;;  %v3489_v17 = vcombine.high %v3464_v14, %v3480_v15  ;;  %v3491_v18 = vcombine.high %v3471_v12, %v3487_v13  ;;  %v3488_v19 = vcombine.low %v3464_v14, %v3480_v15 }
 0xc62   : > { %3497 = vrot.lane.b32.xlu1 %v3490_v16, %s5504_s14  ;;  %3493 = vrot.lane.b32.xlu0 %v3489_v17, %s5505_s18  ;;  %s4458_s14 = sshll.u32 %s4597_s4, 4  ;;  %s4459_s14 = int_to_ptr.vmem [resolvable:$false] %s4458_s14 }
 0xc63   : > { %s4460_s18 = scalar_lea.vmem %s4459_s14, 256  ;;  %p4461_p5 = scmp.lt.s32.totalorder %s3643_s15, %s4459_s14 }
 0xc64   : > { %p4462_p7 = scmp.lt.s32.totalorder %s4460_s18, %s4454_s23 }
 0xc66   : > { %3501 = vrot.lane.b32.xlu0 %v3491_v18, %s5506_s12  ;;  %p4463_p8 = por %p4462_p7, %p4461_p5 }
 0xc68   : > { %p4464_p6 = pnand %p4463_p8, %p4457_p10 }
 0xcd4   : > { %v3494_v23 = vpop.permute.xlu0 %3493  ;;  %v3498_v20 = vpop.permute.xlu1 %3497 }
 0xcd5   : > { %v3504_v21 = vsel %vm1199_vm2, %v3488_v19, %v3494_v23 }
 0xcd6   : > { %v3505_v22 = vsel %vm1989_vm3, %v3504_v21, %v3498_v20 }
 0xcd8   : > { %v3502_v8 = vpop.permute.xlu0 %3501 }
 0xcd9   : > { %v3506_v30 = vsel %vm1991_vm4, %v3505_v22, %v3502_v8 }
 0xcda   : > { %4096 = vmatmul.mubr.msk.f32.vlgmr.msra.gmra.mrb[16].mxu0 %vm683_vm1, %v3506_v30 }
 0xdad   : > { %v3587_v25 = vpop.f32.mrb[16].mxu0 }
 0xdae   : > { %v3588_v26 = vadd.f32 %v3896_v24, %v3587_v25  ;;  %v4097_v27 = vpop.f32.mrb[17].mxu0 }
 0xdb0   : > { %v3591_v28 = vadd.f32 %v3588_v26, %v5169_v32 }
 0xdb2   : > { %v3592_v29 = vsel %vm683_vm1, %v3591_v28, 0.0 }
 0xdb3   : > { %3593 = vadd.xlane.f32.xlu1 %v3592_v29 }
 0xe40   : > { %v3594_v31 = vpop.xlane.xlu1 %3593 }
 0xe41   : > { %v3595_v11 = vmul.f32 0.03125, %v3594_v31 }
 0xe43   : > { %v3596_v33 = vsub.f32 %v3591_v28, %v3595_v11 }
 0xe45   : > { %v3597_v34 = vmul.f32 %v3596_v33, %v3596_v33 }
 0xe47   : > { %v3598_v35 = vsel %vm683_vm1, %v3597_v34, 0.0 }
 0xe48   : > { %3599 = vadd.xlane.f32.xlu0 %v3598_v35 }
 0xe49   : > { %4467 = shalt.err (!%p4464_p6)
}
 0xe4a   : > { %s4468_s12 = scalar_lea.hbm %s5348_s11, 128  ;;  %s4472_s16 = scalar_lea.hbm %s5508_s22, 256 }
 0xe4b   : > { %p4469_p11 = scmp.ne.s32.totalorder %s5348_s11, %s4468_s12  ;;  %p4473_p12 = scmp.lt.u32.totalorder %s5348_s11, %s5508_s22 }
 0xe4c   : > { %p4474_p3 = scmp.lt.u32.totalorder %s4472_s16, %s4468_s12  ;;  %p4476_p0 = scmp.lt.u32.totalorder %s4468_s12, %s5348_s11 }
 0xe4d   : > { %p4470_p1 = pnand %p4469_p11, %p5510_p2 }
 0xe4e   : > { %p4475_p13 = por %p4474_p3, %p4473_p12 }
 0xe4f   : > { %p4471_p9 = pneg %p4470_p1 }
 0xe50   : > { %p4477_p4 = por %p4476_p0, %p4475_p13 }
 0xe52   : > { %p4478_p10 = pnand %p4477_p4, %p4471_p9 }
 0xe54   : > { %4481 = shalt.err (!%p4478_p10)
}
 0xe55   : > { %4148 = dma.vmem_to_hbm [thread:$0]  (%p5510_p2), %s3643_s15, 128, %s5348_s11, %s3624_s19  }
 0xe56   : > { %s5511_s4 = sld [smem:[#allocation35_spill]]  ;;  %s5512_s12 = sld [smem:[#allocation36_spill]] }
 0xe57   : > { %s669_s20 = scalar_lea.vmem [#allocation14], %s4951_s26  ;;  %s5513_s19 = sld [smem:[#allocation38_spill]] }
 0xe58   : > { %s3655_s30 = sshll.u32 %s669_s20, 4  ;;  %s3629_s9 = scalar_lea.sflag [#allocation15], %s4948_s21  ;;  %s5384_s30 = int_to_ptr.vmem [resolvable:$true] %s3655_s30 }
 0xe59   : > { %s4482_s2 = scalar_lea.vmem %s5384_s30, 128  ;;  %s4598_s26 = smov [#allocation14]  }
 0xe5a   : > { %p4483_p5 = scmp.ne.s32.totalorder %s5384_s30, %s4482_s2  ;;  %s4486_s0 = sshll.u32 %s4598_s26, 4  ;;  %s4487_s0 = int_to_ptr.vmem [resolvable:$false] %s4486_s0 }
 0xe5b   : > { %s4488_s1 = scalar_lea.vmem %s4487_s0, 256  ;;  %p4489_p6 = scmp.lt.s32.totalorder %s5384_s30, %s4487_s0 }
 0xe5c   : > { %v3898_v39 = vld [vmem:[%s5511_s4] ss:$0 sm:$0xff]  ;;  %p4484_p7 = pnand %p4483_p5, %p5510_p2  ;;  %p4490_p11 = scmp.lt.s32.totalorder %s4488_s1, %s4482_s2 }
 0xe5d   : > { %v3899_v41 = vld [vmem:[%s5512_s12] ss:$0 sm:$0xff]  ;;  %s5382_s16 = scalar_lea.hbm %s5513_s19, %s3902_s17 }
 0xe5e   : > { %p4485_p8 = pneg %p4484_p7  ;;  %p4491_p1 = por %p4490_p11, %p4489_p6 }
 0xe60   : > { %p4492_p9 = pnand %p4491_p1, %p4485_p8 }
 0xed5   : > { %v3600_v32 = vpop.xlane.xlu0 %3599 }
 0xed6   : > { %v3601_v36 = vmul.f32 0.03125, %v3600_v32 }
 0xed8   : > { %v3602_v37 = vadd.f32 1e-05, %v3601_v36 }
 0xeda   : > { %4280 = vrsqrt.f32 %v3602_v37 }
 0xee4   : > { %v4281_v38 = vpop.eup %4280 }
 0xee5   : > { %v3604_v40 = vmul.f32 %v4281_v38, %v3596_v33 }
 0xee7   : > { %v3612_v42 = vmul.f32 %v3898_v39, %v3604_v40 }
 0xee9   : > { %v3620_v43 = vadd.f32 %v3899_v41, %v3612_v42 }
 0xeeb   : > { %3622 = vst.msk [vmem:[%s669_s20] sm:$0xff] %vm683_vm1, %v3620_v43 }
 0xeec   : > { %4495 = shalt.err (!%p4492_p9)
}
 0xeed   : > { %s4496_s21 = scalar_lea.hbm %s5382_s16, 128  ;;  %s4500_s4 = scalar_lea.hbm %s5513_s19, 256 }
 0xeee   : > { %p4497_p12 = scmp.ne.s32.totalorder %s5382_s16, %s4496_s21  ;;  %p4501_p0 = scmp.lt.u32.totalorder %s5382_s16, %s5513_s19 }
 0xeef   : > { %p4502_p4 = scmp.lt.u32.totalorder %s4500_s4, %s4496_s21  ;;  %p4504_p5 = scmp.lt.u32.totalorder %s4496_s21, %s5382_s16 }
 0xef0   : > { %p4498_p3 = pnand %p4497_p12, %p5510_p2 }
 0xef1   : > { %p4503_p10 = por %p4502_p4, %p4501_p0 }
 0xef2   : > { %p4499_p13 = pneg %p4498_p3 }
 0xef3   : > { %p4505_p7 = por %p4504_p5, %p4503_p10 }
 0xef5   : > { %p4506_p8 = pnand %p4505_p7, %p4499_p13 }
 0xef7   : > { %4509 = shalt.err (!%p4506_p8)
}
 0xef8   : > { %4149 = dma.vmem_to_hbm [thread:$0]  (%p5510_p2), %s5384_s30, 128, %s5382_s16, %s3629_s9  }
 0xef9 PF: > { %s3667_s12 = sand.u32 1, %s4556_s24   ;;  %p5514_p6 = scmp.ne.s32.totalorder %s5489_s28, 0 }
 0xefa   : > { %p5515_p11 = scmp.ge.s32.totalorder %s4568_s27, 2  ;;  %s3668_s20 = scalar_lea.sflag [#allocation4], %s3667_s12 }
 0xefc   : > { %p4173_p1 = pnand %p5515_p11, %p5514_p6 }
 0xefe   : > { %4547 = dma.done.wait (!%p4173_p1), %s3668_s20, 128  }
 0xeff   : > { %4549 = vsyncadd (!%p4173_p1), %s3668_s20, 4294967168  ;;  %s3677_s11 = scalar_lea.sflag [#allocation15], %s3667_s12 }
 0xf00   : > { %4551 = dma.done.wait (!%p4173_p1), %s3677_s11, 128  }
 0xf01   : > { %4553 = vsyncadd (!%p4173_p1), %s3677_s11, 4294967168  ;;  %s5516_s27 = sld [smem:[#allocation24_spill]]  ;;  %s5517_s13 = sld [smem:[#allocation23_spill]] }
 0xf02   : > { %s5518_s26 = sld [smem:[#allocation25_spill]]  ;;  %s5519_s24 = smov %s4560_s25 }
 0xf07   : > { %p39_p2 = scmp.ge.s32.totalorder %s5516_s27, 4   ;;  %s5520_s25 = smov %s5517_s13 }
 0xf09   :  { %41 = sbr.rel (!%p39_p2) target bundleno = 25 (0x19), region = 175 }
 0xf10   :  { %3682 = vsyncpa [#allocation3], 1 }
 0xf11   :  { %3684 = vsyncpa [#allocation3 + $0x1], 1 }
 0xf12   :  { %3685 = vsyncpa [#allocation6], 1 }
 0xf13   :  { %3687 = vsyncpa [#allocation6 + $0x1], 1 }
 0xf14   :  { %3688 = vsyncpa [#allocation9], 1 }
 0xf15   :  { %3689 = vsyncpa [#allocation12], 1 }
 0xf16   :  { %3690 = vsyncpa [#allocation4], 1 }
 0xf17   :  { %3692 = vsyncpa [#allocation4 + $0x1], 1 }
 0xf18   :  { %3693 = vsyncpa [#allocation15], 1 }
 0xf19   :  { %3695 = vsyncpa [#allocation15 + $0x1], 1 }

</bundles_post_ra>
